<compile_context>
chip_gen: v7x
topology: tpu7x:2x2x1
jax: 0.10.0
libtpu: 0.0.40
codegen_flags: <defaults>
</compile_context>

<pallas_src>
import functools

import jax
import jax.numpy as jnp
from jax import lax
from jax.experimental import pallas as pl
from jax.experimental.pallas import tpu as pltpu

LANES = 128


def _round_up(x, m):
    return (x + m - 1) // m * m


# ---------------------------------------------------------------------------
# Pass 1: convolution (KH*KW shifted matmuls) + per-channel sum / sum-of-squares
# ---------------------------------------------------------------------------
def _conv_stats_kernel(x_ref, w_ref, conv_ref, stats_ref, *, img_w, out_w, ksize):
    # x_ref:     [Ho*W + halo, Cin]      bf16  (flattened (h,w) rows of ONE image)
    # w_ref:     [KH*KW, Cin, Cout_pad]  bf16
    # conv_ref:  [Ho*W, Cout_pad]        f32   (full-width rows; cols w >= Wo invalid)
    # stats_ref: [2, Cout_pad]           f32   (row0 = sum, row1 = sumsq) accumulator
    kh_sz, kw_sz = ksize
    n_rows, cpad = conv_ref.shape

    acc = jnp.zeros((n_rows, cpad), jnp.float32)
    for kh in range(kh_sz):
        for kw in range(kw_sz):
            off = kh * img_w + kw                                  # static shift
            lhs = x_ref[pl.ds(off, n_rows), :]                     # [Ho*W, Cin] bf16
            acc = acc + jnp.dot(lhs, w_ref[kh * kw_sz + kw],
                                preferred_element_type=jnp.float32)
    conv_ref[...] = acc

    # Mask invalid full-width columns (w >= Wo) out of the BN statistics.
    col = lax.broadcasted_iota(jnp.int32, (n_rows, cpad), 0) % img_w
    masked = jnp.where(col < out_w, acc, 0.0)
    tile_stats = jnp.concatenate(
        [jnp.sum(masked, axis=0, keepdims=True),
         jnp.sum(masked * masked, axis=0, keepdims=True)], axis=0)

    @pl.when(pl.program_id(0) == 0)
    def _init():
        stats_ref[...] = jnp.zeros_like(stats_ref)

    stats_ref[...] += tile_stats


# ---------------------------------------------------------------------------
# Pass 2: batch-norm (train-mode biased batch stats) + affine + ReLU
# ---------------------------------------------------------------------------
def _bn_relu_kernel(conv_ref, stats_ref, gamma_ref, beta_ref, o_ref, *, count, eps):
    inv_count = 1.0 / count
    st = stats_ref[...]                                            # [2, C]
    mean = st[0:1, :] * inv_count
    var = jnp.maximum(st[1:2, :] * inv_count - mean * mean, 0.0)
    inv_std = lax.rsqrt(var + eps)
    scale = gamma_ref[...] * inv_std                               # [1, C]
    shift = beta_ref[...] - mean * scale                           # [1, C]
    y = conv_ref[...] * scale + shift                              # [rows, C]
    o_ref[...] = jnp.maximum(y, 0.0).astype(o_ref.dtype)


# ---------------------------------------------------------------------------
# Wrapper
# ---------------------------------------------------------------------------
def conv_bn_relu_pallas(x_nchw, w_oihw, gamma, beta, *, stride=1, pad=0, eps=1e-5):
    """ConvBnRelu forward. x_nchw: [N, Cin, H, W], w_oihw: [Cout, Cin, KH, KW]."""
    assert stride == 1  # TODO(synk): strided conv not implemented (module default)
    N, Cin, H, W = x_nchw.shape
    Cout, _, KH, KW = w_oihw.shape

    # --- glue: NCHW -> NHWC, zero padding, flatten (h, w) rows ---
    x = jnp.transpose(x_nchw, (0, 2, 3, 1))                        # [N, H, W, Cin]
    if pad:
        x = jnp.pad(x, ((0, 0), (pad, pad), (pad, pad), (0, 0)))
    Hp, Wp = H + 2 * pad, W + 2 * pad
    Ho, Wo = Hp - KH + 1, Wp - KW + 1
    assert Ho > 0 and Wo > 0

    cout_pad = _round_up(Cout, LANES)                              # lane-dense channels
    rows_out = Ho * Wp                                             # full-width output rows
    halo = (KH - 1) * Wp + (KW - 1)
    rows_in = rows_out + halo                                      # = Hp*Wp + KW - 1

    x_flat = x.reshape(N, Hp * Wp, Cin)
    x_flat = jnp.pad(x_flat, ((0, 0), (0, rows_in - Hp * Wp), (0, 0)))
    x_flat = x_flat.astype(jnp.bfloat16)                           # bf16 MXU operands

    # weights: OIHW -> [KH*KW, Cin, Cout_pad], zero-padded output channels
    w_taps = jnp.transpose(w_oihw, (2, 3, 1, 0)).reshape(KH * KW, Cin, Cout)
    w_taps = jnp.pad(w_taps, ((0, 0), (0, 0), (0, cout_pad - Cout))).astype(jnp.bfloat16)

    gamma_p = jnp.pad(gamma.astype(jnp.float32), (0, cout_pad - Cout)).reshape(1, cout_pad)
    beta_p = jnp.pad(beta.astype(jnp.float32), (0, cout_pad - Cout)).reshape(1, cout_pad)

    count = N * Ho * Wo
    k_eff = KH * KW * Cin

    # --- pass 1: conv tiles + per-channel sum / sumsq (accumulated across grid) ---
    flops = 2 * N * rows_out * k_eff * cout_pad
    bytes_accessed = (x_flat.size * 2 + w_taps.size * 2
                      + N * rows_out * cout_pad * 4 + 2 * cout_pad * 4)
    conv_full, stats = pl.pallas_call(
        functools.partial(_conv_stats_kernel, img_w=Wp, out_w=Wo, ksize=(KH, KW)),
        grid=(N,),
        in_specs=[
            pl.BlockSpec((None, rows_in, Cin), lambda n: (n, 0, 0)),
            pl.BlockSpec((KH * KW, Cin, cout_pad), lambda n: (0, 0, 0)),
        ],
        out_specs=(
            pl.BlockSpec((None, rows_out, cout_pad), lambda n: (n, 0, 0)),
            pl.BlockSpec((2, cout_pad), lambda n: (0, 0)),
        ),
        out_shape=(
            jax.ShapeDtypeStruct((N, rows_out, cout_pad), jnp.float32),
            jax.ShapeDtypeStruct((2, cout_pad), jnp.float32),
        ),
        compiler_params=pltpu.CompilerParams(
            dimension_semantics=("arbitrary",),          # stats carried across grid
            vmem_limit_bytes=32 * 1024 * 1024),
        cost_estimate=pl.CostEstimate(flops=flops, transcendentals=0,
                                      bytes_accessed=bytes_accessed),
    )(x_flat, w_taps)

    # --- pass 2: normalize + affine + ReLU (fully parallel over tiles) ---
    out_full = pl.pallas_call(
        functools.partial(_bn_relu_kernel, count=float(count), eps=eps),
        grid=(N,),
        in_specs=[
            pl.BlockSpec((None, rows_out, cout_pad), lambda n: (n, 0, 0)),
            pl.BlockSpec((2, cout_pad), lambda n: (0, 0)),
            pl.BlockSpec((1, cout_pad), lambda n: (0, 0)),
            pl.BlockSpec((1, cout_pad), lambda n: (0, 0)),
        ],
        out_specs=pl.BlockSpec((None, rows_out, cout_pad), lambda n: (n, 0, 0)),
        out_shape=jax.ShapeDtypeStruct((N, rows_out, cout_pad), jnp.float32),
        compiler_params=pltpu.CompilerParams(
            dimension_semantics=("parallel",),
            vmem_limit_bytes=32 * 1024 * 1024),
    )(conv_full, stats, gamma_p, beta_p)

    # --- glue: strip width / channel padding, back to NCHW ---
    out = out_full.reshape(N, Ho, Wp, cout_pad)[:, :, :Wo, :Cout]
    return jnp.transpose(out, (0, 3, 1, 2))                        # [N, Cout, Ho, Wo]


def _reference(x_nchw, w_oihw, gamma, beta, eps=1e-5):
    conv = lax.conv_general_dilated(
        x_nchw, w_oihw, window_strides=(1, 1), padding="VALID",
        dimension_numbers=("NCHW", "OIHW", "NCHW"))
    mean = jnp.mean(conv, axis=(0, 2, 3), keepdims=True)
    var = jnp.mean((conv - mean) ** 2, axis=(0, 2, 3), keepdims=True)
    y = (conv - mean) * lax.rsqrt(var + eps)
    y = y * gamma.reshape(1, -1, 1, 1) + beta.reshape(1, -1, 1, 1)
    return jnp.maximum(y, 0.0)


if __name__ == "__main__":
    key = jax.random.PRNGKey(0)
    kx, kw = jax.random.split(key)

    # ConvBnRelu(in_ch=4, out_ch=8, ks=3, pad=0, stride=1)
    N, Cin, H, W = 2, 4, 16, 16
    Cout, KS = 8, 3

    x = jax.random.normal(kx, (N, Cin, H, W), dtype=jnp.float32)
    w = jax.random.normal(kw, (Cout, Cin, KS, KS), dtype=jnp.float32) * 0.1
    gamma = jnp.ones((Cout,), dtype=jnp.float32)    # nn.BatchNorm2d default weight
    beta = jnp.zeros((Cout,), dtype=jnp.float32)    # nn.BatchNorm2d default bias

    out = conv_bn_relu_pallas(x, w, gamma, beta)
    out = jax.block_until_ready(out)

    assert out.shape == (N, Cout, H - KS + 1, W - KS + 1)
    assert bool(jnp.all(jnp.isfinite(out)))

    # The kernel feeds the MXU with bf16 operands (f32 accumulation), so compare
    # against the f32 reference evaluated on the same bf16-rounded inputs.
    x_bf = x.astype(jnp.bfloat16).astype(jnp.float32)
    w_bf = w.astype(jnp.bfloat16).astype(jnp.float32)
    ref = _reference(x_bf, w_bf, gamma, beta)
    assert jnp.allclose(out, ref, atol=1e-3, rtol=1e-3), "mismatch vs reference"

    print("KERNEL_OK")
</pallas_src>

<mosaic_0001>
module attributes {stable_mosaic.version = 11 : i64} {
  func.func @_conv_stats_kernel(%arg0: i32, %arg1: memref<1x258x4xbf16, #tpu.memory_space<vmem>>, %arg2: memref<9x4x128xbf16, #tpu.memory_space<vmem>>, %arg3: memref<1x224x128xf32, #tpu.memory_space<vmem>>, %arg4: memref<2x128xf32, #tpu.memory_space<vmem>>) attributes {dimension_semantics = [#tpu.dimension_semantics<arbitrary>], iteration_bounds = array<i64: 2>, scalar_prefetch = 0 : i64, scratch_operands = 0 : i64, tpu.core_type = #tpu.core_type<tc>, window_params = [{transform_indices = @transform_0, window_bounds = array<i64: 1, 258, 4>}, {pipeline_mode = #tpu.pipeline_mode<synchronous>, transform_indices = @transform_1, window_bounds = array<i64: 9, 4, 128>}, {transform_indices = @transform_2, window_bounds = array<i64: 1, 224, 128>}, {pipeline_mode = #tpu.pipeline_mode<synchronous>, transform_indices = @transform_3, window_bounds = array<i64: 2, 128>}]} {
    %cst = arith.constant 0.000000e+00 : f32
    %0 = vector.broadcast %cst : f32 to vector<224x128xf32>
    %c0 = arith.constant 0 : index
    %c0_0 = arith.constant 0 : index
    %c0_1 = arith.constant 0 : index
    %1 = vector.load %arg1[%c0, %c0_0, %c0_1] : memref<1x258x4xbf16, #tpu.memory_space<vmem>>, vector<1x224x4xbf16>
    %2 = vector.shape_cast %1 : vector<1x224x4xbf16> to vector<224x4xbf16>
    %c0_2 = arith.constant 0 : index
    %c0_3 = arith.constant 0 : index
    %c0_4 = arith.constant 0 : index
    %3 = vector.load %arg2[%c0_2, %c0_3, %c0_4] : memref<9x4x128xbf16, #tpu.memory_space<vmem>>, vector<1x4x128xbf16>
    %4 = vector.shape_cast %3 : vector<1x4x128xbf16> to vector<4x128xbf16>
    %cst_5 = arith.constant dense<0.000000e+00> : vector<224x128xf32>
    %5 = tpu.matmul %2, %4, %cst_5 {dimension_numbers = #tpu.dot_dimension_numbers<[1], [0], [0], [1], [0, 0, 1, 1], [], []>} : vector<224x4xbf16>, vector<4x128xbf16>, vector<224x128xf32> -> vector<224x128xf32>
    %6 = arith.addf %0, %5 : vector<224x128xf32>
    %c0_6 = arith.constant 0 : index
    %c1 = arith.constant 1 : index
    %c0_7 = arith.constant 0 : index
    %7 = vector.load %arg1[%c0_6, %c1, %c0_7] : memref<1x258x4xbf16, #tpu.memory_space<vmem>>, vector<1x224x4xbf16>
    %8 = vector.shape_cast %7 : vector<1x224x4xbf16> to vector<224x4xbf16>
    %c1_8 = arith.constant 1 : index
    %c0_9 = arith.constant 0 : index
    %c0_10 = arith.constant 0 : index
    %9 = vector.load %arg2[%c1_8, %c0_9, %c0_10] : memref<9x4x128xbf16, #tpu.memory_space<vmem>>, vector<1x4x128xbf16>
    %10 = vector.shape_cast %9 : vector<1x4x128xbf16> to vector<4x128xbf16>
    %cst_11 = arith.constant dense<0.000000e+00> : vector<224x128xf32>
    %11 = tpu.matmul %8, %10, %cst_11 {dimension_numbers = #tpu.dot_dimension_numbers<[1], [0], [0], [1], [0, 0, 1, 1], [], []>} : vector<224x4xbf16>, vector<4x128xbf16>, vector<224x128xf32> -> vector<224x128xf32>
    %12 = arith.addf %6, %11 : vector<224x128xf32>
    %c0_12 = arith.constant 0 : index
    %c2 = arith.constant 2 : index
    %c0_13 = arith.constant 0 : index
    %13 = vector.load %arg1[%c0_12, %c2, %c0_13] : memref<1x258x4xbf16, #tpu.memory_space<vmem>>, vector<1x224x4xbf16>
    %14 = vector.shape_cast %13 : vector<1x224x4xbf16> to vector<224x4xbf16>
    %c2_14 = arith.constant 2 : index
    %c0_15 = arith.constant 0 : index
    %c0_16 = arith.constant 0 : index
    %15 = vector.load %arg2[%c2_14, %c0_15, %c0_16] : memref<9x4x128xbf16, #tpu.memory_space<vmem>>, vector<1x4x128xbf16>
    %16 = vector.shape_cast %15 : vector<1x4x128xbf16> to vector<4x128xbf16>
    %cst_17 = arith.constant dense<0.000000e+00> : vector<224x128xf32>
    %17 = tpu.matmul %14, %16, %cst_17 {dimension_numbers = #tpu.dot_dimension_numbers<[1], [0], [0], [1], [0, 0, 1, 1], [], []>} : vector<224x4xbf16>, vector<4x128xbf16>, vector<224x128xf32> -> vector<224x128xf32>
    %18 = arith.addf %12, %17 : vector<224x128xf32>
    %c0_18 = arith.constant 0 : index
    %c16 = arith.constant 16 : index
    %c0_19 = arith.constant 0 : index
    %19 = vector.load %arg1[%c0_18, %c16, %c0_19] : memref<1x258x4xbf16, #tpu.memory_space<vmem>>, vector<1x224x4xbf16>
    %20 = vector.shape_cast %19 : vector<1x224x4xbf16> to vector<224x4xbf16>
    %c3 = arith.constant 3 : index
    %c0_20 = arith.constant 0 : index
    %c0_21 = arith.constant 0 : index
    %21 = vector.load %arg2[%c3, %c0_20, %c0_21] : memref<9x4x128xbf16, #tpu.memory_space<vmem>>, vector<1x4x128xbf16>
    %22 = vector.shape_cast %21 : vector<1x4x128xbf16> to vector<4x128xbf16>
    %cst_22 = arith.constant dense<0.000000e+00> : vector<224x128xf32>
    %23 = tpu.matmul %20, %22, %cst_22 {dimension_numbers = #tpu.dot_dimension_numbers<[1], [0], [0], [1], [0, 0, 1, 1], [], []>} : vector<224x4xbf16>, vector<4x128xbf16>, vector<224x128xf32> -> vector<224x128xf32>
    %24 = arith.addf %18, %23 : vector<224x128xf32>
    %c0_23 = arith.constant 0 : index
    %c17 = arith.constant 17 : index
    %c0_24 = arith.constant 0 : index
    %25 = vector.load %arg1[%c0_23, %c17, %c0_24] : memref<1x258x4xbf16, #tpu.memory_space<vmem>>, vector<1x224x4xbf16>
    %26 = vector.shape_cast %25 : vector<1x224x4xbf16> to vector<224x4xbf16>
    %c4 = arith.constant 4 : index
    %c0_25 = arith.constant 0 : index
    %c0_26 = arith.constant 0 : index
    %27 = vector.load %arg2[%c4, %c0_25, %c0_26] : memref<9x4x128xbf16, #tpu.memory_space<vmem>>, vector<1x4x128xbf16>
    %28 = vector.shape_cast %27 : vector<1x4x128xbf16> to vector<4x128xbf16>
    %cst_27 = arith.constant dense<0.000000e+00> : vector<224x128xf32>
    %29 = tpu.matmul %26, %28, %cst_27 {dimension_numbers = #tpu.dot_dimension_numbers<[1], [0], [0], [1], [0, 0, 1, 1], [], []>} : vector<224x4xbf16>, vector<4x128xbf16>, vector<224x128xf32> -> vector<224x128xf32>
    %30 = arith.addf %24, %29 : vector<224x128xf32>
    %c0_28 = arith.constant 0 : index
    %c18 = arith.constant 18 : index
    %c0_29 = arith.constant 0 : index
    %31 = vector.load %arg1[%c0_28, %c18, %c0_29] : memref<1x258x4xbf16, #tpu.memory_space<vmem>>, vector<1x224x4xbf16>
    %32 = vector.shape_cast %31 : vector<1x224x4xbf16> to vector<224x4xbf16>
    %c5 = arith.constant 5 : index
    %c0_30 = arith.constant 0 : index
    %c0_31 = arith.constant 0 : index
    %33 = vector.load %arg2[%c5, %c0_30, %c0_31] : memref<9x4x128xbf16, #tpu.memory_space<vmem>>, vector<1x4x128xbf16>
    %34 = vector.shape_cast %33 : vector<1x4x128xbf16> to vector<4x128xbf16>
    %cst_32 = arith.constant dense<0.000000e+00> : vector<224x128xf32>
    %35 = tpu.matmul %32, %34, %cst_32 {dimension_numbers = #tpu.dot_dimension_numbers<[1], [0], [0], [1], [0, 0, 1, 1], [], []>} : vector<224x4xbf16>, vector<4x128xbf16>, vector<224x128xf32> -> vector<224x128xf32>
    %36 = arith.addf %30, %35 : vector<224x128xf32>
    %c0_33 = arith.constant 0 : index
    %c32 = arith.constant 32 : index
    %c0_34 = arith.constant 0 : index
    %37 = vector.load %arg1[%c0_33, %c32, %c0_34] : memref<1x258x4xbf16, #tpu.memory_space<vmem>>, vector<1x224x4xbf16>
    %38 = vector.shape_cast %37 : vector<1x224x4xbf16> to vector<224x4xbf16>
    %c6 = arith.constant 6 : index
    %c0_35 = arith.constant 0 : index
    %c0_36 = arith.constant 0 : index
    %39 = vector.load %arg2[%c6, %c0_35, %c0_36] : memref<9x4x128xbf16, #tpu.memory_space<vmem>>, vector<1x4x128xbf16>
    %40 = vector.shape_cast %39 : vector<1x4x128xbf16> to vector<4x128xbf16>
    %cst_37 = arith.constant dense<0.000000e+00> : vector<224x128xf32>
    %41 = tpu.matmul %38, %40, %cst_37 {dimension_numbers = #tpu.dot_dimension_numbers<[1], [0], [0], [1], [0, 0, 1, 1], [], []>} : vector<224x4xbf16>, vector<4x128xbf16>, vector<224x128xf32> -> vector<224x128xf32>
    %42 = arith.addf %36, %41 : vector<224x128xf32>
    %c0_38 = arith.constant 0 : index
    %c33 = arith.constant 33 : index
    %c0_39 = arith.constant 0 : index
    %43 = vector.load %arg1[%c0_38, %c33, %c0_39] : memref<1x258x4xbf16, #tpu.memory_space<vmem>>, vector<1x224x4xbf16>
    %44 = vector.shape_cast %43 : vector<1x224x4xbf16> to vector<224x4xbf16>
    %c7 = arith.constant 7 : index
    %c0_40 = arith.constant 0 : index
    %c0_41 = arith.constant 0 : index
    %45 = vector.load %arg2[%c7, %c0_40, %c0_41] : memref<9x4x128xbf16, #tpu.memory_space<vmem>>, vector<1x4x128xbf16>
    %46 = vector.shape_cast %45 : vector<1x4x128xbf16> to vector<4x128xbf16>
    %cst_42 = arith.constant dense<0.000000e+00> : vector<224x128xf32>
    %47 = tpu.matmul %44, %46, %cst_42 {dimension_numbers = #tpu.dot_dimension_numbers<[1], [0], [0], [1], [0, 0, 1, 1], [], []>} : vector<224x4xbf16>, vector<4x128xbf16>, vector<224x128xf32> -> vector<224x128xf32>
    %48 = arith.addf %42, %47 : vector<224x128xf32>
    %c0_43 = arith.constant 0 : index
    %c34 = arith.constant 34 : index
    %c0_44 = arith.constant 0 : index
    %49 = vector.load %arg1[%c0_43, %c34, %c0_44] : memref<1x258x4xbf16, #tpu.memory_space<vmem>>, vector<1x224x4xbf16>
    %50 = vector.shape_cast %49 : vector<1x224x4xbf16> to vector<224x4xbf16>
    %c8 = arith.constant 8 : index
    %c0_45 = arith.constant 0 : index
    %c0_46 = arith.constant 0 : index
    %51 = vector.load %arg2[%c8, %c0_45, %c0_46] : memref<9x4x128xbf16, #tpu.memory_space<vmem>>, vector<1x4x128xbf16>
    %52 = vector.shape_cast %51 : vector<1x4x128xbf16> to vector<4x128xbf16>
    %cst_47 = arith.constant dense<0.000000e+00> : vector<224x128xf32>
    %53 = tpu.matmul %50, %52, %cst_47 {dimension_numbers = #tpu.dot_dimension_numbers<[1], [0], [0], [1], [0, 0, 1, 1], [], []>} : vector<224x4xbf16>, vector<4x128xbf16>, vector<224x128xf32> -> vector<224x128xf32>
    %54 = arith.addf %48, %53 : vector<224x128xf32>
    %c0_48 = arith.constant 0 : index
    %c0_49 = arith.constant 0 : index
    %c0_50 = arith.constant 0 : index
    %55 = vector.load %arg3[%c0_48, %c0_49, %c0_50] : memref<1x224x128xf32, #tpu.memory_space<vmem>>, vector<1x224x128xf32>
    %56 = vector.shape_cast %55 : vector<1x224x128xf32> to vector<224x128xf32>
    %57 = vector.shape_cast %54 : vector<224x128xf32> to vector<1x224x128xf32>
    tpu.vector_store %arg3[%c0_48, %c0_49, %c0_50], %57 {strides = array<i32>} : memref<1x224x128xf32, #tpu.memory_space<vmem>>, vector<1x224x128xf32>,
    %58 = tpu.iota {dimensions = array<i32: 0>} : vector<224x128xi32>
    %c16_i32 = arith.constant 16 : i32
    %c0_i32 = arith.constant 0 : i32
    %59 = arith.cmpi eq, %c16_i32, %c0_i32 : i32
    %c1_i32 = arith.constant 1 : i32
    %60 = arith.select %59, %c1_i32, %c16_i32 : i32
    %61 = vector.broadcast %60 : i32 to vector<224x128xi32>
    %62 = arith.remsi %58, %61 : vector<224x128xi32>
    %c0_i32_51 = arith.constant 0 : i32
    %63 = vector.broadcast %c0_i32_51 : i32 to vector<224x128xi32>
    %64 = arith.cmpi ne, %62, %63 : vector<224x128xi32>
    %c0_i32_52 = arith.constant 0 : i32
    %65 = vector.broadcast %c0_i32_52 : i32 to vector<224x128xi32>
    %66 = arith.cmpi slt, %62, %65 : vector<224x128xi32>
    %c0_i32_53 = arith.constant 0 : i32
    %67 = arith.cmpi slt, %60, %c0_i32_53 : i32
    %68 = vector.broadcast %67 : i1 to vector<224x128xi1>
    %69 = vector.broadcast %68 : vector<224x128xi1> to vector<224x128xi1>
    %70 = arith.xori %66, %69 : vector<224x128xi1>
    %71 = arith.andi %70, %64 : vector<224x128xi1>
    %72 = vector.broadcast %60 : i32 to vector<224x128xi32>
    %73 = arith.addi %62, %72 : vector<224x128xi32>
    %74 = arith.select %71, %73, %62 : vector<224x128xi1>, vector<224x128xi32>
    %c14_i32 = arith.constant 14 : i32
    %75 = vector.broadcast %c14_i32 : i32 to vector<224x128xi32>
    %76 = arith.cmpi slt, %74, %75 : vector<224x128xi32>
    %cst_54 = arith.constant 0.000000e+00 : f32
    %77 = vector.broadcast %cst_54 : f32 to vector<224x128xf32>
    %78 = arith.select %76, %54, %77 : vector<224x128xi1>, vector<224x128xf32>
    %cst_55 = arith.constant dense<0.000000e+00> : vector<128xf32>
    %79 = vector.multi_reduction <add>, %78, %cst_55 [0] : vector<224x128xf32> to vector<128xf32>
    %80 = vector.shape_cast %79 : vector<128xf32> to vector<1x128xf32>
    %81 = arith.mulf %78, %78 : vector<224x128xf32>
    %cst_56 = arith.constant dense<0.000000e+00> : vector<128xf32>
    %82 = vector.multi_reduction <add>, %81, %cst_56 [0] : vector<224x128xf32> to vector<128xf32>
    %83 = vector.shape_cast %82 : vector<128xf32> to vector<1x128xf32>
    %84 = tpu.concatenate %80, %83 in 0 : vector<1x128xf32>, vector<1x128xf32> -> vector<2x128xf32>
    %c0_i32_57 = arith.constant 0 : i32
    %85 = arith.cmpi eq, %arg0, %c0_i32_57 : i32
    %86 = arith.extui %85 : i1 to i32
    %c0_i32_58 = arith.constant 0 : i32
    %87 = arith.cmpi ne, %86, %c0_i32_58 : i32
    scf.if %87 {
      %cst_63 = arith.constant 0.000000e+00 : f32
      %91 = vector.broadcast %cst_63 : f32 to vector<2x128xf32>
      %c0_64 = arith.constant 0 : index
      %c0_65 = arith.constant 0 : index
      %92 = vector.load %arg4[%c0_64, %c0_65] : memref<2x128xf32, #tpu.memory_space<vmem>>, vector<2x128xf32>
      tpu.vector_store %arg4[%c0_64, %c0_65], %91 {strides = array<i32>} : memref<2x128xf32, #tpu.memory_space<vmem>>, vector<2x128xf32>,
    } else {
    }
    %c0_59 = arith.constant 0 : index
    %c0_60 = arith.constant 0 : index
    %88 = vector.load %arg4[%c0_59, %c0_60] : memref<2x128xf32, #tpu.memory_space<vmem>>, vector<2x128xf32>
    %89 = arith.addf %88, %84 : vector<2x128xf32>
    %c0_61 = arith.constant 0 : index
    %c0_62 = arith.constant 0 : index
    %90 = vector.load %arg4[%c0_61, %c0_62] : memref<2x128xf32, #tpu.memory_space<vmem>>, vector<2x128xf32>
    tpu.vector_store %arg4[%c0_61, %c0_62], %89 {strides = array<i32>} : memref<2x128xf32, #tpu.memory_space<vmem>>, vector<2x128xf32>,
    return
  }
  func.func @transform_0(%arg0: i32) -> (i32, i32, i32) {
    %c0_i32 = arith.constant 0 : i32
    %c0_i32_0 = arith.constant 0 : i32
    %c0_i32_1 = arith.constant 0 : i32
    return %arg0, %c0_i32, %c0_i32_0 : i32, i32, i32
  }
  func.func @transform_1(%arg0: i32) -> (i32, i32, i32) {
    %c0_i32 = arith.constant 0 : i32
    %c0_i32_0 = arith.constant 0 : i32
    %c0_i32_1 = arith.constant 0 : i32
    %c0_i32_2 = arith.constant 0 : i32
    return %c0_i32, %c0_i32_0, %c0_i32_1 : i32, i32, i32
  }
  func.func @transform_2(%arg0: i32) -> (i32, i32, i32) {
    %c0_i32 = arith.constant 0 : i32
    %c0_i32_0 = arith.constant 0 : i32
    %c0_i32_1 = arith.constant 0 : i32
    return %arg0, %c0_i32, %c0_i32_0 : i32, i32, i32
  }
  func.func @transform_3(%arg0: i32) -> (i32, i32) {
    %c0_i32 = arith.constant 0 : i32
    %c0_i32_0 = arith.constant 0 : i32
    %c0_i32_1 = arith.constant 0 : i32
    return %c0_i32, %c0_i32_0 : i32, i32
  }
}

</mosaic_0001>

<bundles_post_ra>
// kernel: tpu_custom_call.1
= control target key start
LH: loop header
LB: loop body
LE: loop exit
PB: predicated region body
PF: predicated region fallthrough
CT: control target
= control target key end

     0   :  { %9 = vsyncpa [#allocation3], 0  ;;  %s5640_s0 = inlined_call_operand.vmem [shape: bf16[2,258,4], index: 0, kind: input, shape index: {}]   ;;  %s5641_s1 = inlined_call_operand.vmem [shape: bf16[9,4,128], index: 1, kind: input, shape index: {}]   ;;  %s5642_s2 = inlined_call_operand.hbm [shape: f32[2,224,128], index: 2, kind: output, shape index: {0}]   ;;  %s5643_s3 = inlined_call_operand.hbm [shape: f32[2,128], index: 3, kind: output, shape index: {1}]  }
   0x1   :  { %11 = vsyncpa [#allocation3 + $0x1], 0 }
   0x2   :  { %12 = vsyncpa [#allocation5], 0  ;;  %s4791_s12 = smov 0   ;;  %s4793_s13 = smov 0  }
   0x3   :  { %s4795_s14 = smov 0   ;;  %s4797_s15 = smov 0  }
   0x4 LB: > { %s4812_s16 = sadd.s32 4294967295, %s4764_s15   ;;  %s3682_s17 = sadd.s32 4294967294, %s4764_s15   ;;  %s4764_s15 = sphi %s4797_s15, %s5659_s15   ;;  %s4760_s14 = sphi %s4795_s14, %s5658_s14   ;;  %s4756_s13 = sphi %s4793_s13, %s5657_s13   ;;  %s4752_s12 = sphi %s4791_s12, %s5656_s12  }
   0x5   : > { %s4816_s18 = sadd.s32 1, %s4764_s15   ;;  %s72_s19 = sadd.s32 1, %s4760_s14 }
   0x6   : > { %s69_s20 = ssub.s32 %s4764_s15, %s4816_s18  ;;  %p82_p0 = scmp.ne.s32.totalorder %s4760_s14, %s4756_s13 }
   0x7   : > { %p70_p1 = scmp.eq.s32.totalorder %s69_s20, 0  ;;  %p83_p2 = scmp.eq.s32.totalorder %s4812_s16, 1 }
   0x8   : > { %p88_p3 = scmp.ne.s32.totalorder %s4756_s13, %s4752_s12  ;;  %p89_p4 = scmp.eq.s32.totalorder %s3682_s17, 1 }
   0x9   : > { %s4827_s21 = scalar_select %p70_p1, %s4760_s14, %s72_s19  }
   0xa   : > { %p4831_p5 = por %p83_p2, %p82_p0  ;;  %p4835_p6 = por %p89_p4, %p88_p3 }
   0xb   : > { %p3685_p7 = scmp.ge.s32.totalorder %s4764_s15, 1  ;;  %p139_p8 = scmp.lt.s32.totalorder %s4764_s15, 3 }
   0xd   : > { %p140_p9 = pnand %p3685_p7, %p139_p8 }
   0xe   : > { %vm434_vm0 = vcmask (!%p140_p9), 1041408   ;;  %v4844_v0 = vld [vmem:[%s5641_s1 + $0x8] sm:$0x3] (!%p140_p9)  ;;  %v3687_v1 = vld [vmem:[%s5641_s1 + $0x2] sm:$0x3] (!%p140_p9)  ;;  %p163_p10 = scmp.lt.s32.totalorder (!%p140_p9), %s4812_s16, 1 }
   0xf   : > { %143 = sbr.rel (%p140_p9) target bundleno = 578 (0x242), region = 28  ;;  %4538 = vmatprep.subr.msk.bf16.mxu0 (!%p140_p9), %vm434_vm0, %v4844_v0  ;;  %4534 = vmatprep.subr.msk.bf16.mxu1 (!%p140_p9), %vm434_vm0, %v3687_v1  ;;  %v4855_v2 = vsel (!%p140_p9), %vm434_vm0, %v4844_v0, 0  ;;  %v436_v3 = vsel (!%p140_p9), %vm434_vm0, %v3687_v1, 0  ;;  %v3806_v4 = vld [vmem:[%s5641_s1 + $0xa] sm:$0x3] (!%p140_p9)  ;;  %vm391_vm2 = vcmask (!%p140_p9), 31744  }
  0x10   : > { %4159 = vmatpush3.bf16.msra.mxu0 (!%p140_p9), %v4855_v2  ;;  %4039 = vmatpush3.bf16.msra.mxu1 (!%p140_p9), %v436_v3  ;;  %v197_v5 = vld [vmem:[%s5641_s1] sm:$0x3] (!%p140_p9)  ;;  %vm274_vm1 = vsmask.f32 (!%p140_p9), 7424  ;;  %v4874_v6 = vsel (!%p140_p9), %vm434_vm0, %v3806_v4, 0  ;;  %vm765_vm3 = vcmask (!%p140_p9), 1046528  }
  0x11   : > { %4540 = vmatprep.subr.msk.bf16.mxu0 (!%p140_p9), %vm434_vm0, %v3806_v4  ;;  %4535 = vmatprep.subr.msk.bf16.mxu1 (!%p140_p9), %vm434_vm0, %v197_v5  ;;  %v612_v12 = vsel (!%p140_p9), %vm434_vm0, %v197_v5, 0  ;;  %v4920_v39 = vld [vmem:[%s5641_s1 + $0x4] sm:$0x3] (!%p140_p9)  ;;  %v4938_v53 = vld [vmem:[%s5641_s1 + $0xc] sm:$0x3] (!%p140_p9)  ;;  %s158_s29 = sand.u32 (!%p140_p9), 1, %s4756_s13  }
  0x12   : > { %s4544_s30 = smul.u32 (!%p140_p9), 224, %s158_s29  ;;  %p3897_p11 = scmp.ne.s32.totalorder (!%p140_p9), %s4812_s16, 0 }
  0x14   : > { %s5486_s4 = scalar_lea.vmem (!%p140_p9), [#allocation2], %s4544_s30 }
  0x16   : > { %s164_s28 = scalar_select %p163_p10, %s4812_s16, 1 }
  0x18   : > { %s4545_s6 = smul.u32 132, %s164_s28 }
  0x1a   : > { %s4871_s9 = scalar_lea.vmem %s5640_s0, %s4545_s6 }
  0x1b   : > { %v169_v7 = vld [vmem:[%s4871_s9] sm:$0xf]  ;;  %v4878_v8 = vld [vmem:[%s4871_s9 + $0x4] sm:$0xf]  ;;  %v4884_v10 = vld [vmem:[%s4871_s9 + $0x8] sm:$0xff]  }
  0x1c   : > { %v4881_v9 = vcombine.low %v169_v7, %v4878_v8  ;;  %v1331_v11 = vld [vmem:[%s4871_s9 + $0x8] sm:$0xf]  ;;  %v4889_v13 = vld [vmem:[%s4871_s9 + $0xc] sm:$0xf]  ;;  %v283_v16 = vshll.u32 %v4884_v10, 16  ;;  %v287_v17 = vshrl.u32 %v4884_v10, 16 }
  0x1d   : > { %v4896_v18 = vld [vmem:[%s4871_s9 + $0x10] sm:$0xff]   ;;  %v3777_v20 = vcombine.low %v1331_v11, %v4889_v13  ;;  %v4906_v28 = vld [vmem:[%s4871_s9 + $0x18] sm:$0xff]   ;;  %v4913_v34 = vld [vmem:[%s4871_s9 + $0x20] sm:$0xff]  }
  0x1e   : > { %v276_v14 = vshrl.u32 %v4881_v9, 16  ;;  %v278_v15 = vshll.u32 %v4881_v9, 16  ;;  %v4899_v19 = vld [vmem:[%s4871_s9 + $0x10] sm:$0xff]   ;;  %v285_v22 = vrot.slane %v283_v16, 1  ;;  %v1443_v23 = vshll.u32 %v4896_v18, 16  ;;  %v4909_v32 = vld [vmem:[%s4871_s9 + $0x18] sm:$0xff]  }
  0x1f   : > { %v1447_v24 = vshrl.u32 %v4896_v18, 16  ;;  %v1436_v25 = vshrl.u32 %v3777_v20, 16  ;;  %v1438_v26 = vshll.u32 %v3777_v20, 16  ;;  %v291_v27 = vshll.u32 %v4899_v19, 16  ;;  %v4928_v48 = vld [vmem:[%s4871_s9 + $0x20] sm:$0xff]   ;;  %v4933_v52 = vld [vmem:[%s4871_s9 + $0x28] sm:$0xff]  }
  0x20   : > { %v280_v21 = vrot.slane %v278_v15, 1  ;;  %v289_v30 = vor.u32 %v287_v17, %v285_v22  ;;  %v1445_v31 = vrot.slane %v1443_v23, 1  ;;  %v295_v33 = vshrl.u32 %v4899_v19, 16  ;;  %v4944_v58 = vld [vmem:[%s4871_s9 + $0x28] sm:$0xff]   ;;  %v4958_v5 = vld [vmem:[%s4871_s9 + $0x30] sm:$0xff]   ;;  %v4973_v23 = vld [vmem:[%s4871_s9 + $0x38] sm:$0xff]  }
  0x21   : > { %v1440_v35 = vrot.slane %v1438_v26, 1  ;;  %v293_v36 = vrot.slane %v291_v27, 1  ;;  %v1451_v37 = vshll.u32 %v4906_v28, 16  ;;  %v1455_v38 = vshrl.u32 %v4906_v28, 16 }
  0x22   : > { %v281_v29 = vor.u32 %v280_v21, %v276_v14  ;;  %v1449_v41 = vor.u32 %v1447_v24, %v1445_v31  ;;  %v299_v42 = vshll.u32 %v4909_v32, 16  ;;  %v1459_v43 = vshll.u32 %v4913_v34, 16  ;;  %v4964_v14 = vld [vmem:[%s4871_s9 + $0x30] sm:$0xff]  }
  0x23   : > { %v1441_v44 = vor.u32 %v1440_v35, %v1436_v25  ;;  %v294_v45 = vsel %vm274_vm1, %v289_v30, %v293_v36  ;;  %v1453_v46 = vrot.slane %v1451_v37, 1  ;;  %v297_v47 = vor.u32 %v295_v33, %v293_v36  ;;  %v4977_v25 = vld [vmem:[%s4871_s9 + $0x38] sm:$0xff]   ;;  %v4986_v36 = vld [vmem:[%s4871_s9 + $0x40] sm:$0xff]  }
  0x24   : > { %v286_v40 = vsel %vm274_vm1, %v281_v29, %v285_v22  ;;  %v301_v49 = vrot.slane %v299_v42, 1  ;;  %v1461_v50 = vrot.slane %v1459_v43, 1  ;;  %v303_v51 = vshrl.u32 %v4909_v32, 16 }
  0x25   : > { %4040 = vmatprep.mubr.msk.bf16.mxu1 %vm391_vm2, %v286_v40  ;;  %v1446_v54 = vsel %vm274_vm1, %v1441_v44, %v1445_v31  ;;  %v1454_v55 = vsel %vm274_vm1, %v1449_v41, %v1453_v46  ;;  %v1457_v56 = vor.u32 %v1455_v38, %v1453_v46  ;;  %v307_v57 = vshll.u32 %v4928_v48, 16  ;;  %v4992_v41 = vld [vmem:[%s4871_s9 + $0x40] sm:$0xff]   ;;  %v4997_v46 = vld [vmem:[%s4871_s9 + $0x48] sm:$0xff]  }
  0x26   : > { %4041 = vmatmul.mubr.msk.bf16.vlgmr.msra.gmra.mrb[0].mxu1 %vm391_vm2, %v294_v45  ;;  %4160 = vmatprep.mubr.msk.bf16.mxu0 %vm391_vm2, %v1446_v54  ;;  %v302_v59 = vsel %vm274_vm1, %v297_v47, %v301_v49  ;;  %v305_v60 = vor.u32 %v303_v51, %v301_v49  ;;  %v1463_v61 = vshrl.u32 %v4913_v34, 16  ;;  %v1467_v62 = vshll.u32 %v4933_v52, 16 }
  0x27   : > { %4069 = vmatpush3.bf16.msra.mxu1 %v612_v12  ;;  %4161 = vmatmul.mubr.msk.bf16.vlgmr.msra.gmra.mrb[0].mxu0 %vm391_vm2, %v1454_v55  ;;  %v1462_v63 = vsel %vm274_vm1, %v1457_v56, %v1461_v50  ;;  %v309_v1 = vrot.slane %v307_v57, 1  ;;  %v311_v3 = vshrl.u32 %v4928_v48, 16  ;;  %v315_v4 = vshll.u32 %v4944_v58, 16  ;;  %v1769_v57 = vld [vmem:[%s4871_s9 + $0x8] sm:$0xe] }
  0x28   : > { %4536 = vmatprep.subr.msk.bf16.mxu1 %vm434_vm0, %v4920_v39  ;;  %4044 = vmatprep.mubr.msk.bf16.mxu1 %vm391_vm2, %v302_v59  ;;  %v1465_v7 = vor.u32 %v1463_v61, %v1461_v50  ;;  %v1469_v11 = vrot.slane %v1467_v62, 1  ;;  %v1471_v12 = vshrl.u32 %v4933_v52, 16  ;;  %v319_v15 = vshrl.u32 %v4944_v58, 16  ;;  %v5002_v50 = vld [vmem:[%s4871_s9 + $0x48] sm:$0xff]  }
  0x29   : > { %4189 = vmatpush3.bf16.msra.mxu0 %v4874_v6  ;;  %4164 = vmatprep.mubr.msk.bf16.mxu0 %vm391_vm2, %v1462_v63  ;;  %v310_v16 = vsel %vm274_vm1, %v305_v60, %v309_v1  ;;  %v313_v17 = vor.u32 %v311_v3, %v309_v1  ;;  %v317_v20 = vrot.slane %v315_v4, 1  ;;  %v1475_v21 = vshll.u32 %v4958_v5, 16  ;;  %v5015_v4 = vld [vmem:[%s4871_s9 + $0x50] sm:$0xff]  }
  0x2a   : > { %4541 = vmatprep.subr.msk.bf16.mxu0 %vm434_vm0, %v4938_v53  ;;  %v1473_v6 = vor.u32 %v1471_v12, %v1469_v11  ;;  %v323_v22 = vshll.u32 %v4964_v14, 16  ;;  %v1479_v24 = vshrl.u32 %v4958_v5, 16  ;;  %v327_v29 = vshrl.u32 %v4964_v14, 16 }
  0x2b   : > { %v318_v26 = vsel %vm274_vm1, %v313_v17, %v317_v20  ;;  %v1477_v27 = vrot.slane %v1475_v21, 1  ;;  %v1470_v30 = vsel %vm274_vm1, %v1465_v7, %v1469_v11  ;;  %v1483_v33 = vshll.u32 %v4973_v23, 16  ;;  %v5021_v17 = vld [vmem:[%s4871_s9 + $0x58] sm:$0xff]  }
  0x2c   : > { %v325_v31 = vrot.slane %v323_v22, 1  ;;  %v331_v35 = vshll.u32 %v4977_v25, 16  ;;  %v321_v38 = vor.u32 %v319_v15, %v317_v20  ;;  %v1487_v40 = vshrl.u32 %v4973_v23, 16 }
  0x2d   : > { %v1478_v37 = vsel %vm274_vm1, %v1473_v6, %v1477_v27  ;;  %v1485_v44 = vrot.slane %v1483_v33, 1  ;;  %v1491_v45 = vshll.u32 %v4986_v36, 16  ;;  %v1481_v47 = vor.u32 %v1479_v24, %v1477_v27 }
  0x2e   : > { %4045 = vmatmul.mubr.msk.bf16.gmra.mrb[4].mxu1 %vm391_vm2, %v310_v16  ;;  %v329_v42 = vor.u32 %v327_v29, %v325_v31  ;;  %v333_v43 = vrot.slane %v331_v35, 1  ;;  %v339_v49 = vshll.u32 %v4992_v41, 16  ;;  %v326_v51 = vsel %vm274_vm1, %v321_v38, %v325_v31  ;;  %v5038_v35 = vld [vmem:[%s4871_s9 + $0x60] sm:$0xff]   ;;  %v5043_v38 = vld [vmem:[%s4871_s9 + $0x68] sm:$0xff]  }
  0x2f   : > { %4048 = vmatprep.mubr.msk.bf16.mxu1 %vm391_vm2, %v318_v26  ;;  %4165 = vmatmul.mubr.msk.bf16.gmra.mrb[4].mxu0 %vm391_vm2, %v1470_v30  ;;  %v1489_v54 = vor.u32 %v1487_v40, %v1485_v44  ;;  %v1493_v55 = vrot.slane %v1491_v45, 1  ;;  %v335_v56 = vshrl.u32 %v4977_v25, 16  ;;  %v343_v60 = vshrl.u32 %v4992_v41, 16 }
  0x30   : > { %4168 = vmatprep.mubr.msk.bf16.mxu0 %vm391_vm2, %v1478_v37  ;;  %v334_v59 = vsel %vm274_vm1, %v329_v42, %v333_v43  ;;  %v347_v61 = vshll.u32 %v4997_v46, 16  ;;  %v1486_v62 = vsel %vm274_vm1, %v1481_v47, %v1485_v44  ;;  %v341_v63 = vrot.slane %v339_v49, 1 }
  0x31   : > { %v1495_v1 = vshrl.u32 %v4986_v36, 16  ;;  %v1499_v3 = vshll.u32 %v5002_v50, 16  ;;  %v1494_v7 = vsel %vm274_vm1, %v1489_v54, %v1493_v55  ;;  %v337_v11 = vor.u32 %v335_v56, %v333_v43 }
  0x32   : > { %v3807_v12 = vcombine.low %v1769_v57, %v4889_v13  ;;  %v345_v15 = vor.u32 %v343_v60, %v341_v63  ;;  %v349_v16 = vrot.slane %v347_v61, 1  ;;  %v355_v6 = vshll.u32 %v5015_v4, 16  ;;  %v5067_v61 = vld [vmem:[%s5641_s1 + $0xe] sm:$0x3] }
  0x33   : > { %v1497_v20 = vor.u32 %v1495_v1, %v1493_v55  ;;  %v5025_v21 = vrot.slane %v1499_v3, 1  ;;  %v342_v22 = vsel %vm274_vm1, %v337_v11, %v341_v63  ;;  %v1776_v13 = vrot.slane %v4896_v18, 1  ;;  %v759_v11 = vld [vmem:[%s4871_s9] sm:$0xe] }
  0x34   : > { %v1775_v24 = vrot.slane %v3807_v12, 1  ;;  %v351_v26 = vshrl.u32 %v4997_v46, 16  ;;  %v350_v27 = vsel %vm274_vm1, %v345_v15, %v349_v16  ;;  %v359_v29 = vshrl.u32 %v5015_v4, 16 }
  0x35   : > { %v363_v30 = vshll.u32 %v5021_v17, 16  ;;  %v1502_v31 = vsel %vm274_vm1, %v1497_v20, %v5025_v21  ;;  %v357_v33 = vrot.slane %v355_v6, 1  ;;  %v1778_v43 = vrot.slane %v4906_v28, 1  ;;  %v5057_v28 = vld [vmem:[%s4871_s9 + $0x70] ss:$0 sps:$4 sm:$0x11]  }
  0x36   : > { %4049 = vmatmul.mubr.msk.bf16.gmra.mrb[8].mxu1 %vm391_vm2, %v326_v51  ;;  %v1777_v18 = vsel %vm765_vm3, %v1775_v24, %v1776_v13  ;;  %v353_v37 = vor.u32 %v351_v26, %v349_v16  ;;  %v1780_v44 = vrot.slane %v4913_v34, 1  ;;  %v371_v45 = vshll.u32 %v5038_v35, 16 }
  0x37   : > { %4052 = vmatprep.mubr.msk.bf16.mxu1 %vm391_vm2, %v334_v59  ;;  %4169 = vmatmul.mubr.msk.bf16.gmra.mrb[8].mxu0 %vm391_vm2, %v1486_v62  ;;  %v361_v40 = vor.u32 %v359_v29, %v357_v33  ;;  %v365_v42 = vrot.slane %v363_v30, 1  ;;  %v367_v49 = vshrl.u32 %v5021_v17, 16  ;;  %v379_v51 = vshll.u32 %v5043_v38, 16 }
  0x38   : > { %4172 = vmatprep.mubr.msk.bf16.mxu0 %vm391_vm2, %v1494_v7  ;;  %v358_v47 = vsel %vm274_vm1, %v353_v37, %v357_v33  ;;  %v375_v55 = vshrl.u32 %v5038_v35, 16  ;;  %v767_v56 = vrot.slane %v4884_v10, 1  ;;  %v769_v57 = vrot.slane %v4899_v19, 1 }
  0x39   : > { %v366_v54 = vsel %vm274_vm1, %v361_v40, %v365_v42  ;;  %v1779_v34 = vsel %vm765_vm3, %v1776_v13, %v1778_v43  ;;  %v2165_v59 = vsel %vm434_vm0, %v4938_v53, 0  ;;  %v373_v60 = vrot.slane %v371_v45, 1  ;;  %v5135_v45 = vld [vmem:[%s4871_s9 + $0x68] sm:$0xff]  }
  0x3a   : > { %v1781_v62 = vsel %vm765_vm3, %v1778_v43, %v1780_v44  ;;  %v369_v63 = vor.u32 %v367_v49, %v365_v42  ;;  %v381_v1 = vrot.slane %v379_v51, 1  ;;  %v5074_v3 = vsel %vm765_vm3, %v767_v56, %v769_v57  ;;  %v5121_v42 = vld [vmem:[%s4871_s9 + $0x58] sm:$0xff]   ;;  %v5144_v51 = vld [vmem:[%s4871_s9 + $0x70] sm:$0xff]  }
  0x3b   : > { %v377_v7 = vor.u32 %v375_v55, %v373_v60  ;;  %v1782_v53 = vrot.slane %v4933_v52, 1  ;;  %v3732_v12 = vcombine.low %v759_v11, %v4878_v8  ;;  %v1784_v15 = vrot.slane %v4958_v5, 1 }
  0x3c   : > { %v383_v16 = vshrl.u32 %v5043_v38, 16  ;;  %v374_v20 = vsel %vm274_vm1, %v369_v63, %v373_v60  ;;  %v387_v6 = vshll.u32 %v5057_v28, 16  ;;  %v1788_v30 = vrot.slane %v4986_v36, 1  ;;  %v4627_v63 = vld [vmem:[%s4871_s9 + $0x10] sm:$0xff]  }
  0x3d   : > { %v382_v24 = vsel %vm274_vm1, %v377_v7, %v381_v1  ;;  %v1783_v8 = vsel %vm765_vm3, %v1780_v44, %v1782_v53  ;;  %v1785_v5 = vsel %vm765_vm3, %v1782_v53, %v1784_v15  ;;  %v838_v37 = vsel %vm434_vm0, %v4920_v39, 0  ;;  %v5127_v44 = vld [vmem:[%s4871_s9 + $0x60] sm:$0xff]   ;;  %v5181_v53 = vld [vmem:[%s5641_s1 + $0x10] sm:$0x3] }
  0x3e   : > { %4053 = vmatmul.mubr.msk.bf16.gmra.mrb[12].mxu1 %vm391_vm2, %v342_v22  ;;  %v766_v22 = vrot.slane %v3732_v12, 1  ;;  %v385_v13 = vor.u32 %v383_v16, %v381_v1  ;;  %v389_v26 = vrot.slane %v387_v6, 1  ;;  %v1796_v39 = vrot.slane %v5127_v44, 1  ;;  %v4628_v1 = vld [vmem:[%s4871_s9 + $0x18] sm:$0xff]   ;;  %v4629_v7 = vld [vmem:[%s4871_s9 + $0x20] sm:$0xff]   ;;  %v4630_v12 = vld [vmem:[%s4871_s9 + $0x28] sm:$0xff]  }
  0x3f   : > { %4056 = vmatprep.mubr.msk.bf16.mxu1 %vm391_vm2, %v350_v27  ;;  %4173 = vmatmul.mubr.msk.bf16.gmra.mrb[12].mxu0 %vm391_vm2, %v1502_v31  ;;  %v1786_v27 = vrot.slane %v4973_v23, 1  ;;  %v1790_v23 = vrot.slane %v5002_v50, 1  ;;  %v1800_v55 = vrot.slane %v5144_v51, 1  ;;  %v2603_v11 = vsel %vm434_vm0, %v5067_v61, 0  ;;  %v4634_v16 = vld [vmem:[%s4871_s9 + $0x40] sm:$0xff]  }
  0x40   : > { %4190 = vmatprep.mubr.msk.bf16.mxu0 %vm391_vm2, %v1777_v18  ;;  %v5089_v52 = vsel %vm765_vm3, %v766_v22, %v767_v56  ;;  %v390_v29 = vsel %vm274_vm1, %v385_v13, %v389_v26  ;;  %v5106_v18 = vld [vmem:[%s4871_s9 + $0x50] sm:$0xff]   ;;  %v5151_v56 = vld [vmem:[%s4871_s9 + $0x78] ss:$0 sps:$4 sm:$0x11]   ;;  %v779_v26 = vrot.slane %v4977_v25, 1 }
  0x41   : > { %v1787_v31 = vsel %vm765_vm3, %v1784_v15, %v1786_v27  ;;  %v1789_v33 = vsel %vm765_vm3, %v1786_v27, %v1788_v30  ;;  %v1792_v36 = vrot.slane %v5106_v18, 1  ;;  %v1791_v40 = vsel %vm765_vm3, %v1788_v30, %v1790_v23  ;;  %v4632_v15 = vld [vmem:[%s4871_s9 + $0x38] sm:$0xff]  }
  0x42   : > { %v1802_v60 = vrot.slane %v5151_v56, 1 }
  0x43   : > { %v1793_v43 = vsel %vm765_vm3, %v1790_v23, %v1792_v36 }
  0x46   : > { %4057 = vmatmul.mubr.msk.bf16.gmra.mrb[16].mxu1 %vm391_vm2, %v358_v47 }
  0x47   : > { %4060 = vmatprep.mubr.msk.bf16.mxu1 %vm391_vm2, %v366_v54  ;;  %4191 = vmatmul.mubr.msk.bf16.vlgmr.msra.gmra.mrb[0].mxu0 %vm391_vm2, %v1779_v34  ;;  %v1798_v54 = vrot.slane %v5135_v45, 1 }
  0x48   : > { %4219 = vmatpush3.bf16.msra.mxu0 %v2165_v59  ;;  %4194 = vmatprep.mubr.msk.bf16.mxu0 %vm391_vm2, %v1781_v62  ;;  %v1803_v62 = vsel %vm765_vm3, %v1800_v55, %v1802_v60 }
  0x49   : > { %4542 = vmatprep.subr.msk.bf16.mxu0 %vm434_vm0, %v5067_v61  ;;  %v1799_v34 = vsel %vm765_vm3, %v1796_v39, %v1798_v54  ;;  %v1801_v59 = vsel %vm765_vm3, %v1798_v54, %v1800_v55  ;;  %v4631_v61 = vld [vmem:[%s4871_s9 + $0x30] sm:$0xff]  }
  0x4e   : > { %4061 = vmatmul.mubr.msk.bf16.gmra.mrb[20].mxu1 %vm391_vm2, %v374_v20  ;;  %v771_v20 = vrot.slane %v4909_v32, 1 }
  0x4f   : > { %4064 = vmatprep.mubr.msk.bf16.mxu1 %vm391_vm2, %v382_v24  ;;  %4195 = vmatmul.mubr.msk.bf16.gmra.mrb[4].mxu0 %vm391_vm2, %v1783_v8  ;;  %v4635_v24 = vld [vmem:[%s4871_s9 + $0x48] sm:$0xff]   ;;  %v775_v8 = vrot.slane %v4944_v58, 1 }
  0x50   : > { %4198 = vmatprep.mubr.msk.bf16.mxu0 %vm391_vm2, %v1785_v5  ;;  %v772_v6 = vsel %vm765_vm3, %v769_v57, %v771_v20  ;;  %v5223_v5 = vld [vmem:[%s4871_s9 + $0x14] sm:$0xf] }
  0x56   : > { %4065 = vmatmul.mubr.msk.bf16.gmra.mrb[24].mxu1 %vm391_vm2, %v390_v29  ;;  %v5236_v29 = vld [vmem:[%s4871_s9 + $0x18] sm:$0xff]  }
  0x57   : > { %4070 = vmatprep.mubr.msk.bf16.mxu1 %vm391_vm2, %v4881_v9  ;;  %4199 = vmatmul.mubr.msk.bf16.gmra.mrb[8].mxu0 %vm391_vm2, %v1787_v31  ;;  %v3747_v9 = vld [vmem:[%s5641_s1 + $0x6] sm:$0x3] }
  0x58   : > { %4202 = vmatprep.mubr.msk.bf16.mxu0 %vm391_vm2, %v1789_v33  ;;  %v1156_v22 = vsel %vm434_vm0, %v3747_v9, 0  ;;  %v4639_v33 = vld [vmem:[%s4871_s9 + $0x68] sm:$0xff]  }
  0x5e   : > { %4071 = vmatmul.mubr.msk.bf16.vlgmr.msra.gmra.mrb[0].mxu1 %vm391_vm2, %v4884_v10  ;;  %v1794_v10 = vrot.slane %v5121_v42, 1 }
  0x5f   : > { %4074 = vmatprep.mubr.msk.bf16.mxu1 %vm391_vm2, %v4899_v19  ;;  %4099 = vmatpush3.bf16.msra.mxu1 %v838_v37  ;;  %v2452_v37 = vshll.u32 %v5236_v29, 16 }
  0x60   : > { %4537 = vmatprep.subr.msk.bf16.mxu1 %vm434_vm0, %v3747_v9  ;;  %4203 = vmatmul.mubr.msk.bf16.gmra.mrb[12].mxu0 %vm391_vm2, %v1791_v40  ;;  %v1795_v47 = vsel %vm765_vm3, %v1792_v36, %v1794_v10  ;;  %v1797_v49 = vsel %vm765_vm3, %v1794_v10, %v1796_v39  ;;  %v783_v9 = vrot.slane %v4997_v46, 1  ;;  %v5248_v40 = vld [vmem:[%s4871_s9 + $0x20] sm:$0xff]  }
  0x61   : > { %4206 = vmatprep.mubr.msk.bf16.mxu0 %vm391_vm2, %v1793_v43  ;;  %v2454_v39 = vrot.slane %v2452_v37, 1  ;;  %v2460_v54 = vshll.u32 %v5248_v40, 16  ;;  %v4649_v37 = vld [vmem:[%s4871_s9 + $0x8] sm:$0xff]  }
  0x66   : > { %4075 = vmatmul.mubr.msk.bf16.gmra.mrb[4].mxu1 %vm391_vm2, %v4909_v32  ;;  %v773_v32 = vrot.slane %v4928_v48, 1 }
  0x67   : > { %4078 = vmatprep.mubr.msk.bf16.mxu1 %vm391_vm2, %v4928_v48  ;;  %v4637_v48 = vld [vmem:[%s4871_s9 + $0x58] sm:$0xff]  }
  0x68   : > { %4207 = vmatmul.mubr.msk.bf16.gmra.mrb[16].mxu0 %vm391_vm2, %v1795_v47  ;;  %v774_v19 = vsel %vm765_vm3, %v771_v20, %v773_v32  ;;  %v776_v57 = vsel %vm765_vm3, %v773_v32, %v775_v8  ;;  %v5253_v47 = vld [vmem:[%s4871_s9 + $0x28] sm:$0xff]   ;;  %v2856_v20 = vsel %vm434_vm0, %v5181_v53, 0 }
  0x69   : > { %4210 = vmatprep.mubr.msk.bf16.mxu0 %vm391_vm2, %v1797_v49  ;;  %v4641_v49 = vld [vmem:[%s4871_s9 + $0x78] sm:$0xff]   ;;  %v2468_v60 = vshll.u32 %v5253_v47, 16 }
  0x6e   : > { %4079 = vmatmul.mubr.msk.bf16.gmra.mrb[8].mxu1 %vm391_vm2, %v4944_v58  ;;  %v4638_v58 = vld [vmem:[%s4871_s9 + $0x60] sm:$0xff]  }
  0x6f   : > { %4082 = vmatprep.mubr.msk.bf16.mxu1 %vm391_vm2, %v4964_v14 }
  0x70   : > { %4211 = vmatmul.mubr.msk.bf16.gmra.mrb[20].mxu0 %vm391_vm2, %v1799_v34  ;;  %v785_v34 = vrot.slane %v5015_v4, 1 }
  0x71   : > { %4214 = vmatprep.mubr.msk.bf16.mxu0 %vm391_vm2, %v1801_v59  ;;  %v2464_v59 = vshrl.u32 %v5248_v40, 16 }
  0x76   : > { %4083 = vmatmul.mubr.msk.bf16.gmra.mrb[12].mxu1 %vm391_vm2, %v4977_v25  ;;  %v781_v25 = vrot.slane %v4992_v41, 1 }
  0x77   : > { %4086 = vmatprep.mubr.msk.bf16.mxu1 %vm391_vm2, %v4992_v41 }
  0x78   : > { %4215 = vmatmul.mubr.msk.bf16.gmra.mrb[24].mxu0 %vm391_vm2, %v1803_v62  ;;  %v782_v43 = vsel %vm765_vm3, %v779_v26, %v781_v25  ;;  %v784_v41 = vsel %vm765_vm3, %v781_v25, %v783_v9  ;;  %v787_v62 = vrot.slane %v5021_v17, 1  ;;  %v5309_v25 = vld [vmem:[%s4871_s9 + $0x50] sm:$0xff]  }
  0x79   : > { %4220 = vmatprep.mubr.msk.bf16.mxu0 %vm391_vm2, %v4627_v63  ;;  %v2462_v63 = vrot.slane %v2460_v54, 1  ;;  %v2512_v54 = vshrl.u32 %v5309_v25, 16 }
  0x7e   : > { %4087 = vmatmul.mubr.msk.bf16.gmra.mrb[16].mxu1 %vm391_vm2, %v4997_v46  ;;  %v2456_v46 = vshrl.u32 %v5236_v29, 16 }
  0x7f   : > { %4090 = vmatprep.mubr.msk.bf16.mxu1 %vm391_vm2, %v5015_v4  ;;  %v5273_v4 = vld [vmem:[%s4871_s9 + $0x38] sm:$0xff]  }
  0x80   : > { %4221 = vmatmul.mubr.msk.bf16.vlgmr.msra.gmra.mrb[0].mxu0 %vm391_vm2, %v4628_v1  ;;  %v5268_v1 = vld [vmem:[%s4871_s9 + $0x30] sm:$0xff]   ;;  %v2484_v32 = vshll.u32 %v5273_v4, 16 }
  0x81   : > { %4249 = vmatpush3.bf16.msra.mxu0 %v2603_v11  ;;  %4224 = vmatprep.mubr.msk.bf16.mxu0 %vm391_vm2, %v4629_v7  ;;  %v2458_v7 = vor.u32 %v2456_v46, %v2454_v39  ;;  %v786_v11 = vsel %vm765_vm3, %v783_v9, %v785_v34 }
  0x82   : > { %4543 = vmatprep.subr.msk.bf16.mxu0 %vm434_vm0, %v5181_v53 }
  0x86   : > { %4091 = vmatmul.mubr.msk.bf16.gmra.mrb[20].mxu1 %vm391_vm2, %v5021_v17  ;;  %v2463_v17 = vsel %vm274_vm1, %v2458_v7, %v2462_v63 }
  0x87   : > { %4094 = vmatprep.mubr.msk.bf16.mxu1 %vm391_vm2, %v5038_v35 }
  0x88   : > { %4225 = vmatmul.mubr.msk.bf16.gmra.mrb[4].mxu0 %vm391_vm2, %v4630_v12  ;;  %v2466_v12 = vor.u32 %v2464_v59, %v2462_v63  ;;  %v4651_v59 = vld [vmem:[%s4871_s9 + $0x10] sm:$0xff]  }
  0x89   : > { %4228 = vmatprep.mubr.msk.bf16.mxu0 %vm391_vm2, %v4631_v61  ;;  %v2470_v61 = vrot.slane %v2468_v60, 1 }
  0x8e   : > { %4095 = vmatmul.mubr.msk.bf16.gmra.mrb[24].mxu1 %vm391_vm2, %v5043_v38 }
  0x8f   : > { %4100 = vmatprep.mubr.msk.bf16.mxu1 %vm391_vm2, %v5089_v52  ;;  %v4636_v52 = vld [vmem:[%s4871_s9 + $0x50] sm:$0xff]  }
  0x90   : > { %4229 = vmatmul.mubr.msk.bf16.gmra.mrb[8].mxu0 %vm391_vm2, %v4632_v15  ;;  %v788_v15 = vsel %vm765_vm3, %v785_v34, %v787_v62  ;;  %v5327_v34 = vld [vmem:[%s4871_s9 + $0x60] sm:$0xff]  }
  0x91   : > { %4232 = vmatprep.mubr.msk.bf16.mxu0 %vm391_vm2, %v4634_v16  ;;  %v2476_v16 = vshll.u32 %v5268_v1, 16 }
  0x96   : > { %4101 = vmatmul.mubr.msk.bf16.vlgmr.msra.gmra.mrb[0].mxu1 %vm391_vm2, %v5074_v3  ;;  %v2340_v3 = vld [vmem:[%s4871_s9 + $0x10] sm:$0xf] }
  0x97   : > { %4104 = vmatprep.mubr.msk.bf16.mxu1 %vm391_vm2, %v772_v6  ;;  %4129 = vmatpush3.bf16.msra.mxu1 %v1156_v22  ;;  %v3852_v13 = vcombine.low %v2340_v3, %v5223_v5  ;;  %v2472_v6 = vshrl.u32 %v5253_v47, 16  ;;  %v2471_v22 = vsel %vm274_vm1, %v2466_v12, %v2470_v61  ;;  %v2524_v12 = vshll.u32 %v5327_v34, 16 }
  0x98   : > { %4539 = vmatprep.subr.msk.bf16.mxu1 %vm434_vm0, %v4844_v0  ;;  %4233 = vmatmul.mubr.msk.bf16.gmra.mrb[12].mxu0 %vm391_vm2, %v4635_v24  ;;  %v777_v0 = vrot.slane %v4964_v14, 1  ;;  %v4640_v14 = vld [vmem:[%s4871_s9 + $0x70] sm:$0xff]   ;;  %v789_v24 = vrot.slane %v5038_v35, 1  ;;  %v2486_v35 = vrot.slane %v2484_v32, 1  ;;  %v4657_v32 = vld [vmem:[%s4871_s9 + $0x28] sm:$0xff]  }
  0x99   : > { %4236 = vmatprep.mubr.msk.bf16.mxu0 %vm391_vm2, %v4636_v52  ;;  %v2447_v30 = vshll.u32 %v3852_v13, 16  ;;  %v2445_v23 = vshrl.u32 %v3852_v13, 16  ;;  %v2480_v52 = vshrl.u32 %v5268_v1, 16  ;;  %v2474_v53 = vor.u32 %v2472_v6, %v2470_v61 }
  0x9a   : > { %v778_v27 = vsel %vm765_vm3, %v775_v8, %v777_v0  ;;  %v780_v31 = vsel %vm765_vm3, %v777_v0, %v779_v26  ;;  %v791_v8 = vrot.slane %v5043_v38, 1  ;;  %v790_v3 = vsel %vm765_vm3, %v787_v62, %v789_v24  ;;  %v4653_v62 = vld [vmem:[%s4871_s9 + $0x18] sm:$0xff]  }
  0x9b   : > { %v2449_v36 = vrot.slane %v2447_v30, 1  ;;  %v2488_v26 = vshrl.u32 %v5273_v4, 16  ;;  %v793_v30 = vrot.slane %v5057_v28, 1  ;;  %v5315_v28 = vld [vmem:[%s4871_s9 + $0x58] sm:$0xff]   ;;  %v2526_v6 = vrot.slane %v2524_v12, 1 }
  0x9c   : > { %v792_v0 = vsel %vm765_vm3, %v789_v24, %v791_v8  ;;  %v2516_v46 = vshll.u32 %v5315_v28, 16  ;;  %v4655_v24 = vld [vmem:[%s4871_s9 + $0x20] sm:$0xff]  }
  0x9d   : > { %v2450_v10 = vor.u32 %v2449_v36, %v2445_v23  ;;  %v2490_v23 = vor.u32 %v2488_v26, %v2486_v35  ;;  %v794_v36 = vsel %vm765_vm3, %v791_v8, %v793_v30  ;;  %v4659_v26 = vld [vmem:[%s4871_s9 + $0x30] sm:$0xff]   ;;  %v5366_v30 = vld [vmem:[%s4871_s9 + $0x80] ss:$0 sps:$4 sm:$0x11]  }
  0x9e   : > { %4105 = vmatmul.mubr.msk.bf16.gmra.mrb[4].mxu1 %vm391_vm2, %v774_v19  ;;  %v2478_v19 = vrot.slane %v2476_v16, 1  ;;  %v2518_v7 = vrot.slane %v2516_v46, 1 }
  0x9f   : > { %4108 = vmatprep.mubr.msk.bf16.mxu1 %vm391_vm2, %v776_v57  ;;  %v2455_v55 = vsel %vm274_vm1, %v2450_v10, %v2454_v39  ;;  %v5290_v57 = vld [vmem:[%s4871_s9 + $0x40] sm:$0xff]   ;;  %v2508_v10 = vshll.u32 %v5309_v25, 16 }
  0xa0   : > { %4237 = vmatmul.mubr.msk.bf16.gmra.mrb[16].mxu0 %vm391_vm2, %v4637_v48  ;;  %v2482_v48 = vor.u32 %v2480_v52, %v2478_v19  ;;  %v2492_v38 = vshll.u32 %v5290_v57, 16  ;;  %v2479_v13 = vsel %vm274_vm1, %v2474_v53, %v2478_v19 }
  0xa1   : > { %4240 = vmatprep.mubr.msk.bf16.mxu0 %vm391_vm2, %v4638_v58  ;;  %v5295_v58 = vld [vmem:[%s4871_s9 + $0x48] sm:$0xff]  }
  0xa6   : > { %4109 = vmatmul.mubr.msk.bf16.gmra.mrb[8].mxu1 %vm391_vm2, %v778_v27  ;;  %v2487_v27 = vsel %vm274_vm1, %v2482_v48, %v2486_v35 }
  0xa7   : > { %4112 = vmatprep.mubr.msk.bf16.mxu1 %vm391_vm2, %v780_v31  ;;  %v2496_v31 = vshrl.u32 %v5290_v57, 16 }
  0xa8   : > { %4241 = vmatmul.mubr.msk.bf16.gmra.mrb[20].mxu0 %vm391_vm2, %v4639_v33  ;;  %v2500_v33 = vshll.u32 %v5295_v58, 16 }
  0xa9   : > { %4244 = vmatprep.mubr.msk.bf16.mxu0 %vm391_vm2, %v4640_v14  ;;  %v2494_v14 = vrot.slane %v2492_v38, 1 }
  0xab   : > { %v2498_v9 = vor.u32 %v2496_v31, %v2494_v14  ;;  %v2495_v39 = vsel %vm274_vm1, %v2490_v23, %v2494_v14  ;;  %v4661_v31 = vld [vmem:[%s4871_s9 + $0x38] sm:$0xff]   ;;  %v2778_v23 = vld [vmem:[%s4871_s9 + $0x10] sm:$0xe] }
  0xae   : > { %4113 = vmatmul.mubr.msk.bf16.gmra.mrb[12].mxu1 %vm391_vm2, %v782_v43  ;;  %v2502_v43 = vrot.slane %v2500_v33, 1 }
  0xaf   : > { %4116 = vmatprep.mubr.msk.bf16.mxu1 %vm391_vm2, %v784_v41  ;;  %v2504_v41 = vshrl.u32 %v5295_v58, 16 }
  0xb0   : > { %4245 = vmatmul.mubr.msk.bf16.gmra.mrb[24].mxu0 %vm391_vm2, %v4641_v49  ;;  %v2503_v49 = vsel %vm274_vm1, %v2498_v9, %v2502_v43  ;;  %v2556_v9 = vshll.u32 %v5366_v30, 16 }
  0xb1   : > { %4250 = vmatprep.mubr.msk.bf16.mxu0 %vm391_vm2, %v2455_v55  ;;  %v2510_v55 = vrot.slane %v2508_v10, 1  ;;  %v2506_v60 = vor.u32 %v2504_v41, %v2502_v43  ;;  %v3882_v10 = vcombine.low %v2778_v23, %v5223_v5 }
  0xb3   : > { %v2514_v63 = vor.u32 %v2512_v54, %v2510_v55  ;;  %v2511_v61 = vsel %vm274_vm1, %v2506_v60, %v2510_v55  ;;  %v4665_v54 = vld [vmem:[%s4871_s9 + $0x48] sm:$0xff]   ;;  %v2784_v46 = vrot.slane %v3882_v10, 1  ;;  %v2785_v55 = vrot.slane %v5236_v29, 1  ;;  %v4667_v60 = vld [vmem:[%s4871_s9 + $0x50] sm:$0xff]  }
  0xb4   : > { %v2789_v29 = vrot.slane %v5253_v47, 1  ;;  %v1503_v47 = vshrl.u32 %v5002_v50, 16  ;;  %v2795_v50 = vrot.slane %v5290_v57, 1  ;;  %v1547_v10 = vshll.u32 %v5151_v56, 16 }
  0xb5   : > { %v2519_v16 = vsel %vm274_vm1, %v2514_v63, %v2518_v7  ;;  %v2786_v5 = vsel %vm765_vm3, %v2784_v46, %v2785_v55  ;;  %v4668_v63 = vld [vmem:[%s4871_s9 + $0x58] sm:$0xff]  }
  0xb6   : > { %4117 = vmatmul.mubr.msk.bf16.gmra.mrb[16].mxu1 %vm391_vm2, %v786_v11  ;;  %v5333_v11 = vld [vmem:[%s4871_s9 + $0x68] sm:$0xff]  }
  0xb7   : > { %4120 = vmatprep.mubr.msk.bf16.mxu1 %vm391_vm2, %v788_v15  ;;  %v2520_v15 = vshrl.u32 %v5315_v28, 16  ;;  %v2536_v48 = vshrl.u32 %v5333_v11, 16 }
  0xb8   : > { %4251 = vmatmul.mubr.msk.bf16.vlgmr.msra.gmra.mrb[0].mxu0 %vm391_vm2, %v2463_v17  ;;  %v2528_v17 = vshrl.u32 %v5327_v34, 16 }
  0xb9   : > { %4279 = vmatpush3.bf16.msra.mxu0 %v2856_v20  ;;  %4254 = vmatprep.mubr.msk.bf16.mxu0 %vm391_vm2, %v2471_v22  ;;  %v2532_v20 = vshll.u32 %v5333_v11, 16  ;;  %v5346_v22 = vld [vmem:[%s4871_s9 + $0x70] sm:$0xff]   ;;  %v2522_v52 = vor.u32 %v2520_v15, %v2518_v7  ;;  %v2791_v15 = vrot.slane %v5268_v1, 1 }
  0xba   : > { %v2530_v8 = vor.u32 %v2528_v17, %v2526_v6  ;;  %v2540_v53 = vshll.u32 %v5346_v22, 16  ;;  %v1507_v17 = vshll.u32 %v5106_v18, 16  ;;  %v4671_v1 = vld [vmem:[%s4871_s9 + $0x70] sm:$0xff]  }
  0xbb   : > { %v2534_v19 = vrot.slane %v2532_v20, 1  ;;  %v2792_v20 = vsel %vm765_vm3, %v2789_v29, %v2791_v15 }
  0xbd   : > { %v2535_v35 = vsel %vm274_vm1, %v2530_v8, %v2534_v19  ;;  %v2797_v8 = vrot.slane %v5295_v58, 1  ;;  %v1531_v58 = vshll.u32 %v5135_v45, 16 }
  0xbe   : > { %4121 = vmatmul.mubr.msk.bf16.gmra.mrb[20].mxu1 %vm391_vm2, %v790_v3  ;;  %v2527_v3 = vsel %vm274_vm1, %v2522_v52, %v2526_v6  ;;  %v1509_v52 = vrot.slane %v1507_v17, 1 }
  0xbf   : > { %4124 = vmatprep.mubr.msk.bf16.mxu1 %vm391_vm2, %v792_v0  ;;  %v2544_v0 = vshrl.u32 %v5346_v22, 16  ;;  %v2798_v57 = vsel %vm765_vm3, %v2795_v50, %v2797_v8  ;;  %v1533_v23 = vrot.slane %v1531_v58, 1 }
  0xc0   : > { %4255 = vmatmul.mubr.msk.bf16.gmra.mrb[4].mxu0 %vm391_vm2, %v2479_v13  ;;  %v2542_v13 = vrot.slane %v2540_v53, 1  ;;  %v1519_v53 = vshrl.u32 %v5121_v42, 16 }
  0xc1   : > { %4258 = vmatprep.mubr.msk.bf16.mxu0 %vm391_vm2, %v2487_v27  ;;  %v2538_v27 = vor.u32 %v2536_v48, %v2534_v19 }
  0xc2   : > { %v2546_v33 = vor.u32 %v2544_v0, %v2542_v13 }
  0xc6   : > { %4125 = vmatmul.mubr.msk.bf16.gmra.mrb[24].mxu1 %vm391_vm2, %v794_v36  ;;  %v2543_v36 = vsel %vm274_vm1, %v2538_v27, %v2542_v13  ;;  %v2801_v13 = vrot.slane %v5315_v28, 1 }
  0xc7   : > { %4130 = vmatprep.mubr.msk.bf16.mxu1 %vm391_vm2, %v4649_v37 }
  0xc8   : > { %4259 = vmatmul.mubr.msk.bf16.gmra.mrb[8].mxu0 %vm391_vm2, %v2495_v39  ;;  %v4663_v39 = vld [vmem:[%s4871_s9 + $0x40] sm:$0xff]  }
  0xc9   : > { %4262 = vmatprep.mubr.msk.bf16.mxu0 %vm391_vm2, %v2503_v49  ;;  %v2558_v49 = vrot.slane %v2556_v9, 1  ;;  %v2805_v9 = vrot.slane %v5333_v11, 1 }
  0xce   : > { %4131 = vmatmul.mubr.msk.bf16.vlgmr.msra.gmra.mrb[0].mxu1 %vm391_vm2, %v4651_v59 }
  0xcf   : > { %4134 = vmatprep.mubr.msk.bf16.mxu1 %vm391_vm2, %v4653_v62  ;;  %4309 = vmatpush3.bf16.msra.mxu1 %v4855_v2  ;;  %v5352_v2 = vld [vmem:[%s4871_s9 + $0x78] sm:$0xff]   ;;  %v2787_v62 = vrot.slane %v5248_v40, 1  ;;  %v4670_v40 = vld [vmem:[%s4871_s9 + $0x68] sm:$0xff]  }
  0xd0   : > { %4263 = vmatmul.mubr.msk.bf16.gmra.mrb[12].mxu0 %vm391_vm2, %v2511_v61  ;;  %v2548_v38 = vshll.u32 %v5352_v2, 16  ;;  %v2552_v37 = vshrl.u32 %v5352_v2, 16  ;;  %v4669_v61 = vld [vmem:[%s4871_s9 + $0x60] sm:$0xff]   ;;  %v2809_v11 = vrot.slane %v5352_v2, 1 }
  0xd1   : > { %4266 = vmatprep.mubr.msk.bf16.mxu0 %vm391_vm2, %v2519_v16  ;;  %v2788_v7 = vsel %vm765_vm3, %v2785_v55, %v2787_v62  ;;  %v2790_v12 = vsel %vm765_vm3, %v2787_v62, %v2789_v29  ;;  %v2793_v16 = vrot.slane %v5273_v4, 1  ;;  %v1515_v4 = vshll.u32 %v5121_v42, 16 }
  0xd2   : > { %v2550_v14 = vrot.slane %v2548_v38, 1  ;;  %v2799_v42 = vrot.slane %v5309_v25, 1 }
  0xd3   : > { %v2794_v6 = vsel %vm765_vm3, %v2791_v15, %v2793_v16  ;;  %v1517_v48 = vrot.slane %v1515_v4, 1 }
  0xd4   : > { %v2551_v43 = vsel %vm274_vm1, %v2546_v33, %v2550_v14  ;;  %v2554_v41 = vor.u32 %v2552_v37, %v2550_v14  ;;  %v1539_v33 = vshll.u32 %v5144_v51, 16  ;;  %v2800_v14 = vsel %vm765_vm3, %v2797_v8, %v2799_v42 }
  0xd5   : > { %v1521_v0 = vor.u32 %v1519_v53, %v1517_v48  ;;  %v2802_v25 = vsel %vm765_vm3, %v2799_v42, %v2801_v13 }
  0xd6   : > { %4135 = vmatmul.mubr.msk.bf16.gmra.mrb[4].mxu1 %vm391_vm2, %v4655_v24  ;;  %v2559_v59 = vsel %vm274_vm1, %v2554_v41, %v2558_v49  ;;  %v1505_v24 = vor.u32 %v1503_v47, %v5025_v21  ;;  %v1523_v21 = vshll.u32 %v5127_v44, 16  ;;  %v1541_v28 = vrot.slane %v1539_v33, 1 }
  0xd7   : > { %4138 = vmatprep.mubr.msk.bf16.mxu1 %vm391_vm2, %v4657_v32  ;;  %v1511_v32 = vshrl.u32 %v5106_v18, 16 }
  0xd8   : > { %4267 = vmatmul.mubr.msk.bf16.gmra.mrb[16].mxu0 %vm391_vm2, %v2527_v3  ;;  %v1510_v19 = vsel %vm274_vm1, %v1505_v24, %v1509_v52  ;;  %v2796_v3 = vsel %vm765_vm3, %v2793_v16, %v2795_v50  ;;  %v1525_v18 = vrot.slane %v1523_v21, 1  ;;  %v3059_v16 = vlaneseq }
  0xd9   : > { %4270 = vmatprep.mubr.msk.bf16.mxu0 %vm391_vm2, %v2535_v35  ;;  %v1513_v35 = vor.u32 %v1511_v32, %v1509_v52 }
  0xda   : > { %v1526_v27 = vsel %vm274_vm1, %v1521_v0, %v1525_v18 }
  0xdb   : > { %v1518_v38 = vsel %vm274_vm1, %v1513_v35, %v1517_v48 }
  0xde   : > { %4139 = vmatmul.mubr.msk.bf16.gmra.mrb[8].mxu1 %vm391_vm2, %v4659_v26  ;;  %v1527_v26 = vshrl.u32 %v5127_v44, 16  ;;  %v2803_v44 = vrot.slane %v5327_v34, 1  ;;  %v1549_v34 = vrot.slane %v1547_v10, 1 }
  0xdf   : > { %4142 = vmatprep.mubr.msk.bf16.mxu1 %vm391_vm2, %v4661_v31  ;;  %v1535_v31 = vshrl.u32 %v5135_v45, 16 }
  0xe0   : > { %4271 = vmatmul.mubr.msk.bf16.gmra.mrb[20].mxu0 %vm391_vm2, %v2543_v36  ;;  %v1529_v36 = vor.u32 %v1527_v26, %v1525_v18  ;;  %v2804_v41 = vsel %vm765_vm3, %v2801_v13, %v2803_v44  ;;  %v2806_v49 = vsel %vm765_vm3, %v2803_v44, %v2805_v9 }
  0xe1   : > { %4274 = vmatprep.mubr.msk.bf16.mxu0 %vm391_vm2, %v2551_v43  ;;  %v1537_v37 = vor.u32 %v1535_v31, %v1533_v23  ;;  %v1543_v43 = vshrl.u32 %v5144_v51, 16  ;;  %v2807_v51 = vrot.slane %v5346_v22, 1 }
  0xe2   : > { %v1534_v45 = vsel %vm274_vm1, %v1529_v36, %v1533_v23 }
  0xe3   : > { %v2808_v46 = vsel %vm765_vm3, %v2805_v9, %v2807_v51  ;;  %v2810_v55 = vsel %vm765_vm3, %v2807_v51, %v2809_v11 }
  0xe6   : > { %4143 = vmatmul.mubr.msk.bf16.gmra.mrb[12].mxu1 %vm391_vm2, %v4663_v39  ;;  %v1542_v39 = vsel %vm274_vm1, %v1537_v37, %v1541_v28 }
  0xe7   : > { %4146 = vmatprep.mubr.msk.bf16.mxu1 %vm391_vm2, %v4665_v54  ;;  %v1545_v54 = vor.u32 %v1543_v43, %v1541_v28 }
  0xe8   : > { %4275 = vmatmul.mubr.msk.bf16.gmra.mrb[24].mxu0 %vm391_vm2, %v2559_v59  ;;  %v2811_v59 = vrot.slane %v5366_v30, 1 }
  0xe9   : > { %4280 = vmatprep.mubr.msk.bf16.mxu0 %vm391_vm2, %v2786_v5  ;;  %v1550_v56 = vsel %vm274_vm1, %v1545_v54, %v1549_v34 }
  0xea   : > { %v2812_v5 = vsel %vm765_vm3, %v2809_v11, %v2811_v59 }
  0xee   : > { %4147 = vmatmul.mubr.msk.bf16.gmra.mrb[16].mxu1 %vm391_vm2, %v4667_v60 }
  0xef   : > { %4150 = vmatprep.mubr.msk.bf16.mxu1 %vm391_vm2, %v4668_v63 }
  0xf0   : > { %4281 = vmatmul.mubr.msk.bf16.vlgmr.msra.gmra.mrb[0].mxu0 %vm391_vm2, %v2788_v7 }
  0xf1   : > { %4284 = vmatprep.mubr.msk.bf16.mxu0 %vm391_vm2, %v2790_v12 }
  0xf6   : > { %4151 = vmatmul.mubr.msk.bf16.gmra.mrb[20].mxu1 %vm391_vm2, %v4669_v61 }
  0xf7   : > { %4154 = vmatprep.mubr.msk.bf16.mxu1 %vm391_vm2, %v4670_v40 }
  0xf8   : > { %4285 = vmatmul.mubr.msk.bf16.gmra.mrb[4].mxu0 %vm391_vm2, %v2792_v20 }
  0xf9   : > { %4288 = vmatprep.mubr.msk.bf16.mxu0 %vm391_vm2, %v2794_v6  ;;  %v5476_v6 = vshrl.u32 %v3059_v16, 7 }
  0xfb   : > { %v3061_v52 = vadd.s32 8, %v5476_v6  ;;  %v3067_v0 = vadd.s32 56, %v5476_v6  ;;  %v3071_v34 = vadd.s32 88, %v5476_v6  ;;  %v3077_v44 = vadd.s32 136, %v5476_v6 }
  0xfd   : > { %v3099_v50 = vand.u32 15, %v3061_v52  ;;  %v3141_v31 = vand.u32 15, %v3067_v0 }
  0xfe   : > { %4155 = vmatmul.mubr.msk.bf16.gmra.mrb[24].mxu1 %vm391_vm2, %v4671_v1  ;;  %v3063_v1 = vadd.s32 24, %v5476_v6 }
  0xff   : > { %4176 = vmatprep.mubr.msk.bf16.mxu1 %vm391_vm2, %v1510_v19  ;;  %vm3425_vm4 = vcmp.lt.s32.totalorder %v3099_v50, 14  ;;  %vm3431_vm7 = vcmp.lt.s32.totalorder %v3141_v31, 14  ;;  %v3073_v50 = vadd.s32 104, %v5476_v6 }
 0x100   : > { %4289 = vmatmul.mubr.msk.bf16.gmra.mrb[8].mxu0 %vm391_vm2, %v2796_v3  ;;  %v3113_v19 = vand.u32 15, %v3063_v1  ;;  %v3065_v3 = vadd.s32 40, %v5476_v6  ;;  %v3081_v1 = vadd.s32 168, %v5476_v6 }
 0x101   : > { %4292 = vmatprep.mubr.msk.bf16.mxu0 %vm391_vm2, %v2798_v57 }
 0x102   : > { %vm3427_vm5 = vcmp.lt.s32.totalorder %v3113_v19, 14  ;;  %v3127_v42 = vand.u32 15, %v3065_v3 }
 0x104   : > { %vm5493_vm6 = vcmp.lt.s32.totalorder %v3127_v42, 14 }
 0x106   : > { %4177 = vmatmul.mubr.msk.bf16.vlgmr.msra.gmra.mrb[16].mxu1 %vm391_vm2, %v1518_v38 }
 0x107   : > { %4180 = vmatprep.mubr.msk.bf16.mxu1 %vm391_vm2, %v1526_v27 }
 0x108   : > { %4293 = vmatmul.mubr.msk.bf16.gmra.mrb[12].mxu0 %vm391_vm2, %v2800_v14 }
 0x109   : > { %4296 = vmatprep.mubr.msk.bf16.mxu0 %vm391_vm2, %v2802_v25 }
 0x10e   : > { %4181 = vmatmul.mubr.msk.bf16.gmra.mrb[20].mxu1 %vm391_vm2, %v1534_v45  ;;  %v3069_v45 = vadd.s32 72, %v5476_v6 }
 0x10f   : > { %4184 = vmatprep.mubr.msk.bf16.mxu1 %vm391_vm2, %v1542_v39 }
 0x110   : > { %4297 = vmatmul.mubr.msk.bf16.gmra.mrb[16].mxu0 %vm391_vm2, %v2804_v41 }
 0x111   : > { %4300 = vmatprep.mubr.msk.bf16.mxu0 %vm391_vm2, %v2806_v49 }
 0x116   : > { %4185 = vmatmul.mubr.msk.bf16.gmra.mrb[24].mxu1 %vm391_vm2, %v1550_v56 }
 0x118   : > { %4301 = vmatmul.mubr.msk.bf16.gmra.mrb[20].mxu0 %vm391_vm2, %v2808_v46  ;;  %v3155_v46 = vand.u32 15, %v3069_v45 }
 0x119   : > { %4304 = vmatprep.mubr.msk.bf16.mxu0 %vm391_vm2, %v2810_v55 }
 0x11a   : > { %vm5507_vm8 = vcmp.lt.s32.totalorder %v3155_v46, 14 }
 0x120   : > { %4305 = vmatmul.mubr.msk.bf16.gmra.mrb[24].mxu0 %vm391_vm2, %v2812_v5  ;;  %vm3574_vm2 = vcmask 1040384  }
 0x1a1   : > { %v4132_v22 = vpop.f32.mrb[0].mxu1 }
 0x1a2   : > { %v1192_v60 = vpop.f32.mrb[1].mxu1 }
 0x1a3   : > { %v4133_v62 = vpop.f32.mrb[2].mxu1 }
 0x1a4   : > { %v1195_v2 = vpop.f32.mrb[3].mxu1 }
 0x1a9   : > { %v4136_v63 = vpop.f32.mrb[4].mxu1 }
 0x1aa   : > { %v1208_v29 = vpop.f32.mrb[5].mxu1 }
 0x1ab   : > { %v4137_v7 = vpop.f32.mrb[6].mxu1 }
 0x1ac   : > { %v1211_v12 = vpop.f32.mrb[7].mxu1 }
 0x1b1   : > { %v5462_v61 = vpop.f32.mrb[8].mxu1 }
 0x1b2   : > { %v5464_v15 = vpop.f32.mrb[9].mxu1 }
 0x1b3   : > { %v5466_v40 = vpop.f32.mrb[10].mxu1 }
 0x1b4   : > { %v5468_v30 = vpop.f32.mrb[11].mxu1 }
 0x1b9   : > { %v5470_v47 = vpop.f32.mrb[12].mxu1 }
 0x1ba   : > { %v5472_v17 = vpop.f32.mrb[13].mxu1 }
 0x1bb   : > { %v5474_v20 = vpop.f32.mrb[14].mxu1 }
 0x1bc   : > { %v5478_v24 = vpop.f32.mrb[15].mxu1 }
 0x1c3   : > { %v4282_v4 = vpop.f32.mrb[0].mxu0 }
 0x1c4   : > { %v4310_v32 = vadd.f32 %v4282_v4, %v4132_v22  ;;  %v2892_v8 = vpop.f32.mrb[1].mxu0 }
 0x1c5   : > { %v4311_v53 = vadd.f32 %v2892_v8, %v1192_v60  ;;  %v4283_v21 = vpop.f32.mrb[2].mxu0 }
 0x1c6   : > { %3033 = vst [vmem:[%s5486_s4 + $0x10] sm:$0xff] %v4310_v32  ;;  %v4312_v48 = vadd.f32 %v4283_v21, %v4133_v62  ;;  %v2895_v35 = vpop.f32.mrb[3].mxu0  ;;  %v3515_v33 = vmul.f32 %v4310_v32, %v4310_v32  ;;  %v3169_v62 = vand.u32 15, %v3071_v34  ;;  %v3075_v21 = vadd.s32 120, %v5476_v6 }
 0x1c7   : > { %3031 = vst [vmem:[%s5486_s4] sm:$0xff] %v4311_v53  ;;  %v4313_v57 = vadd.f32 %v2895_v35, %v1195_v2  ;;  %v3513_v58 = vmul.f32 %v4311_v53, %v4311_v53 }
 0x1c8   : > { %3034 = vst [vmem:[%s5486_s4 + $0x18] sm:$0xff] %v4312_v48  ;;  %v3455_v26 = vsel %vm3427_vm5, %v4312_v48, 0.0  ;;  %vm3435_vm9 = vcmp.lt.s32.totalorder %v3169_v62, 14 }
 0x1c9   : > { %3032 = vst [vmem:[%s5486_s4 + $0x8] sm:$0xff] %v4313_v57  ;;  %v3453_v18 = vsel %vm3425_vm4, %v4313_v57, 0.0  ;;  %v3516_v9 = vmul.f32 %v3455_v26, %v3455_v26 }
 0x1ca   : > { %v3480_v38 = vadd.f32 %v4311_v53, %v3453_v18  ;;  %v3514_v13 = vmul.f32 %v3453_v18, %v3453_v18  ;;  %v3183_v18 = vand.u32 15, %v3073_v50 }
 0x1cb   : > { %v4286_v27 = vpop.f32.mrb[4].mxu0 }
 0x1cc   : > { %v3481_v14 = vadd.f32 %v4310_v32, %v3480_v38  ;;  %v3541_v23 = vadd.f32 %v3514_v13, %v3513_v58  ;;  %v4314_v25 = vadd.f32 %v4286_v27, %v4136_v63  ;;  %v2908_v36 = vpop.f32.mrb[5].mxu0  ;;  %vm5523_vm10 = vcmp.lt.s32.totalorder %v3183_v18, 14 }
 0x1cd   : > { %v4315_v37 = vadd.f32 %v2908_v36, %v1208_v29  ;;  %v4287_v28 = vpop.f32.mrb[6].mxu0 }
 0x1ce   : > { %v3542_v43 = vadd.f32 %v3541_v23, %v3515_v33  ;;  %3037 = vst [vmem:[%s5486_s4 + $0x30] sm:$0xff] %v4314_v25  ;;  %v3482_v10 = vadd.f32 %v3481_v14, %v3455_v26  ;;  %v4316_v39 = vadd.f32 %v4287_v28, %v4137_v7  ;;  %v2911_v41 = vpop.f32.mrb[7].mxu0  ;;  %v3519_v2 = vmul.f32 %v4314_v25, %v4314_v25 }
 0x1cf   : > { %3035 = vst [vmem:[%s5486_s4 + $0x20] sm:$0xff] %v4315_v37  ;;  %v3517_v49 = vmul.f32 %v4315_v37, %v4315_v37  ;;  %v4317_v54 = vadd.f32 %v2911_v41, %v1211_v12  ;;  %v3197_v26 = vand.u32 15, %v3075_v21  ;;  %v3079_v41 = vadd.s32 152, %v5476_v6 }
 0x1d0   : > { %v3483_v51 = vadd.f32 %v4315_v37, %v3482_v10  ;;  %v3543_v56 = vadd.f32 %v3542_v43, %v3516_v9  ;;  %3038 = vst [vmem:[%s5486_s4 + $0x38] sm:$0xff] %v4316_v39  ;;  %v3459_v22 = vsel %vm3431_vm7, %v4316_v39, 0.0  ;;  %v3085_v28 = vadd.s32 200, %v5476_v6 }
 0x1d1   : > { %3036 = vst [vmem:[%s5486_s4 + $0x28] sm:$0xff] %v4317_v54  ;;  %v3457_v11 = vsel %vm5493_vm6, %v4317_v54, 0.0  ;;  %v3520_v4 = vmul.f32 %v3459_v22, %v3459_v22  ;;  %vm3439_vm11 = vcmp.lt.s32.totalorder %v3197_v26, 14 }
 0x1d2   : > { %v3544_v55 = vadd.f32 %v3543_v56, %v3517_v49  ;;  %v3484_v59 = vadd.f32 %v3483_v51, %v3457_v11  ;;  %v3518_v5 = vmul.f32 %v3457_v11, %v3457_v11  ;;  %v3211_v11 = vand.u32 15, %v3077_v44 }
 0x1d3   : > { %v4290_v60 = vpop.f32.mrb[8].mxu0 }
 0x1d4   : > { %v3485_v63 = vadd.f32 %v4314_v25, %v3484_v59  ;;  %v3545_v29 = vadd.f32 %v3544_v55, %v3518_v5  ;;  %v4318_v7 = vadd.f32 %v4290_v60, %v5462_v61  ;;  %v2924_v12 = vpop.f32.mrb[9].mxu0  ;;  %vm5537_vm12 = vcmp.lt.s32.totalorder %v3211_v11, 14 }
 0x1d5   : > { %v4319_v16 = vadd.f32 %v2924_v12, %v5464_v15  ;;  %v4291_v52 = vpop.f32.mrb[10].mxu0 }
 0x1d6   : > { %v3546_v32 = vadd.f32 %v3545_v29, %v3519_v2  ;;  %3041 = vst [vmem:[%s5486_s4 + $0x50] sm:$0xff] %v4318_v7  ;;  %v3486_v8 = vadd.f32 %v3485_v63, %v3459_v22  ;;  %v4320_v19 = vadd.f32 %v4291_v52, %v5466_v40  ;;  %v2927_v53 = vpop.f32.mrb[11].mxu0  ;;  %v3523_v31 = vmul.f32 %v4318_v7, %v4318_v7 }
 0x1d7   : > { %3039 = vst [vmem:[%s5486_s4 + $0x40] sm:$0xff] %v4319_v16  ;;  %v3521_v61 = vmul.f32 %v4319_v16, %v4319_v16  ;;  %v4321_v15 = vadd.f32 %v2927_v53, %v5468_v30  ;;  %v3225_v22 = vand.u32 15, %v3079_v41 }
 0x1d8   : > { %v3487_v3 = vadd.f32 %v4319_v16, %v3486_v8  ;;  %v3547_v48 = vadd.f32 %v3546_v32, %v3520_v4  ;;  %3042 = vst [vmem:[%s5486_s4 + $0x58] sm:$0xff] %v4320_v19  ;;  %v3463_v13 = vsel %vm3435_vm9, %v4320_v19, 0.0 }
 0x1d9   : > { %v4178_v35 = vpop.f32.mrb[16].mxu1  ;;  %3040 = vst [vmem:[%s5486_s4 + $0x48] sm:$0xff] %v4321_v15  ;;  %v3461_v57 = vsel %vm5507_vm8, %v4321_v15, 0.0  ;;  %v3524_v45 = vmul.f32 %v3463_v13, %v3463_v13  ;;  %v3083_v15 = vadd.s32 184, %v5476_v6  ;;  %vm3443_vm13 = vcmp.lt.s32.totalorder %v3225_v22, 14 }
 0x1da   : > { %v1694_v0 = vpop.f32.mrb[17].mxu1  ;;  %v3548_v42 = vadd.f32 %v3547_v48, %v3521_v61  ;;  %v3488_v40 = vadd.f32 %v3487_v3, %v3461_v57  ;;  %v3522_v58 = vmul.f32 %v3461_v57, %v3461_v57 }
 0x1db   : > { %v4179_v38 = vpop.f32.mrb[18].mxu1  ;;  %v4294_v30 = vpop.f32.mrb[12].mxu0 }
 0x1dc   : > { %v1697_v27 = vpop.f32.mrb[19].mxu1  ;;  %v3489_v33 = vadd.f32 %v4318_v7, %v3488_v40  ;;  %v3549_v14 = vadd.f32 %v3548_v42, %v3522_v58  ;;  %v4322_v23 = vadd.f32 %v4294_v30, %v5470_v47  ;;  %v2940_v25 = vpop.f32.mrb[13].mxu0  ;;  %v3253_v30 = vand.u32 15, %v3083_v15 }
 0x1dd   : > { %v4323_v36 = vadd.f32 %v2940_v25, %v5472_v17  ;;  %v4295_v37 = vpop.f32.mrb[14].mxu0 }
 0x1de   : > { %v3550_v9 = vadd.f32 %v3549_v14, %v3523_v31  ;;  %3045 = vst [vmem:[%s5486_s4 + $0x70] sm:$0xff] %v4322_v23  ;;  %v3490_v43 = vadd.f32 %v3489_v33, %v3463_v13  ;;  %v4324_v10 = vadd.f32 %v4295_v37, %v5474_v20  ;;  %v2943_v39 = vpop.f32.mrb[15].mxu0  ;;  %v3527_v62 = vmul.f32 %v4322_v23, %v4322_v23 }
 0x1df   : > { %3043 = vst [vmem:[%s5486_s4 + $0x60] sm:$0xff] %v4323_v36  ;;  %v3525_v47 = vmul.f32 %v4323_v36, %v4323_v36  ;;  %v4325_v17 = vadd.f32 %v2943_v39, %v5478_v24  ;;  %vm3447_vm15 = vcmp.lt.s32.totalorder %v3253_v30, 14 }
 0x1e0   : > { %v3491_v49 = vadd.f32 %v4323_v36, %v3490_v43  ;;  %v3551_v54 = vadd.f32 %v3550_v9, %v3524_v45  ;;  %3046 = vst [vmem:[%s5486_s4 + $0x78] sm:$0xff] %v4324_v10  ;;  %v3467_v5 = vsel %vm3439_vm11, %v4324_v10, 0.0 }
 0x1e1   : > { %v4182_v34 = vpop.f32.mrb[20].mxu1  ;;  %3044 = vst [vmem:[%s5486_s4 + $0x68] sm:$0xff] %v4325_v17  ;;  %v3465_v51 = vsel %vm5523_vm10, %v4325_v17, 0.0  ;;  %v3528_v50 = vmul.f32 %v3467_v5, %v3467_v5  ;;  %v3087_v17 = vadd.s32 216, %v5476_v6 }
 0x1e2   : > { %v1710_v56 = vpop.f32.mrb[21].mxu1  ;;  %v3552_v46 = vadd.f32 %v3551_v54, %v3525_v47  ;;  %v3492_v20 = vadd.f32 %v3491_v49, %v3465_v51  ;;  %v3526_v55 = vmul.f32 %v3465_v51, %v3465_v51 }
 0x1e3   : > { %v4183_v59 = vpop.f32.mrb[22].mxu1  ;;  %v4298_v24 = vpop.f32.mrb[16].mxu0 }
 0x1e4   : > { %v1713_v60 = vpop.f32.mrb[23].mxu1  ;;  %v3493_v2 = vadd.f32 %v4322_v23, %v3492_v20  ;;  %v3553_v63 = vadd.f32 %v3552_v46, %v3526_v55  ;;  %v4326_v29 = vadd.f32 %v4298_v24, %v4178_v35  ;;  %v2956_v7 = vpop.f32.mrb[17].mxu0  ;;  %v3281_v55 = vand.u32 15, %v3087_v17 }
 0x1e5   : > { %v4327_v12 = vadd.f32 %v2956_v7, %v1694_v0  ;;  %v4299_v16 = vpop.f32.mrb[18].mxu0  ;;  %v3239_v0 = vand.u32 15, %v3081_v1 }
 0x1e6   : > { %v3554_v4 = vadd.f32 %v3553_v63, %v3527_v62  ;;  %3049 = vst [vmem:[%s5486_s4 + $0x90] sm:$0xff] %v4326_v29  ;;  %v3494_v32 = vadd.f32 %v3493_v2, %v3467_v5  ;;  %v4328_v8 = vadd.f32 %v4299_v16, %v4179_v38  ;;  %v2959_v19 = vpop.f32.mrb[19].mxu0  ;;  %vm3451_vm1 = vcmp.lt.s32.totalorder %v3281_v55, 14 }
 0x1e7   : > { %3047 = vst [vmem:[%s5486_s4 + $0x80] sm:$0xff] %v4327_v12  ;;  %v3529_v53 = vmul.f32 %v4327_v12, %v4327_v12  ;;  %v4329_v61 = vadd.f32 %v2959_v19, %v1697_v27  ;;  %v3531_v27 = vmul.f32 %v4326_v29, %v4326_v29  ;;  %vm5549_vm14 = vcmp.lt.s32.totalorder %v3239_v0, 14 }
 0x1e8   : > { %v3495_v21 = vadd.f32 %v4327_v12, %v3494_v32  ;;  %v3555_v3 = vadd.f32 %v3554_v4, %v3528_v50  ;;  %3050 = vst [vmem:[%s5486_s4 + $0x98] sm:$0xff] %v4328_v8  ;;  %v3471_v38 = vsel %vm3443_vm13, %v4328_v8, 0.0 }
 0x1e9   : > { %v4186_v48 = vpop.f32.mrb[24].mxu1  ;;  %3048 = vst [vmem:[%s5486_s4 + $0x88] sm:$0xff] %v4329_v61  ;;  %v3469_v35 = vsel %vm5537_vm12, %v4329_v61, 0.0  ;;  %v3532_v44 = vmul.f32 %v3471_v38, %v3471_v38 }
 0x1ea   : > { %v1726_v57 = vpop.f32.mrb[25].mxu1  ;;  %v3556_v18 = vadd.f32 %v3555_v3, %v3529_v53  ;;  %v3496_v42 = vadd.f32 %v3495_v21, %v3469_v35  ;;  %v3530_v40 = vmul.f32 %v3469_v35, %v3469_v35 }
 0x1eb   : > { %v4187_v58 = vpop.f32.mrb[26].mxu1  ;;  %v4302_v13 = vpop.f32.mrb[20].mxu0 }
 0x1ec   : > { %v1729_v26 = vpop.f32.mrb[27].mxu1  ;;  %v3497_v31 = vadd.f32 %v4326_v29, %v3496_v42  ;;  %v3557_v33 = vadd.f32 %v3556_v18, %v3530_v40  ;;  %v4330_v14 = vadd.f32 %v4302_v13, %v4182_v34  ;;  %v2972_v23 = vpop.f32.mrb[21].mxu0  ;;  %v3267_v34 = vand.u32 15, %v3085_v28 }
 0x1ed   : > { %v4331_v25 = vadd.f32 %v2972_v23, %v1710_v56  ;;  %v4303_v36 = vpop.f32.mrb[22].mxu0  ;;  %v4766_v23 = vmov (!%p3897_p11), 0.0  }
 0x1ee   : > { %v3558_v45 = vadd.f32 %v3557_v33, %v3531_v27  ;;  %3053 = vst [vmem:[%s5486_s4 + $0xb0] sm:$0xff] %v4330_v14  ;;  %v3498_v9 = vadd.f32 %v3497_v31, %v3471_v38  ;;  %v4332_v43 = vadd.f32 %v4303_v36, %v4183_v59  ;;  %v2975_v10 = vpop.f32.mrb[23].mxu0  ;;  %v3535_v59 = vmul.f32 %v4330_v14, %v4330_v14 }
 0x1ef   : > { %3051 = vst [vmem:[%s5486_s4 + $0xa0] sm:$0xff] %v4331_v25  ;;  %v3533_v39 = vmul.f32 %v4331_v25, %v4331_v25  ;;  %v4333_v47 = vadd.f32 %v2975_v10, %v1713_v60  ;;  %vm3449_vm0 = vcmp.lt.s32.totalorder %v3267_v34, 14  ;;  %3580 = vst [vmem:[#allocation4] sm:$0x3] (!%p3897_p11), %v4766_v23 }
 0x1f0   : > { %v3499_v41 = vadd.f32 %v4331_v25, %v3498_v9  ;;  %v3559_v49 = vadd.f32 %v3558_v45, %v3532_v44  ;;  %3054 = vst [vmem:[%s5486_s4 + $0xb8] sm:$0xff] %v4332_v43  ;;  %v3475_v46 = vsel %vm3447_vm15, %v4332_v43, 0.0 }
 0x1f1   : > { %3052 = vst [vmem:[%s5486_s4 + $0xa8] sm:$0xff] %v4333_v47  ;;  %v3473_v54 = vsel %vm5549_vm14, %v4333_v47, 0.0  ;;  %v3536_v2 = vmul.f32 %v3475_v46, %v3475_v46 }
 0x1f2   : > { %v3560_v51 = vadd.f32 %v3559_v49, %v3533_v39  ;;  %v3500_v56 = vadd.f32 %v3499_v41, %v3473_v54  ;;  %v3534_v11 = vmul.f32 %v3473_v54, %v3473_v54 }
 0x1f3   : > { %v4306_v20 = vpop.f32.mrb[24].mxu0 }
 0x1f4   : > { %v3501_v5 = vadd.f32 %v4330_v14, %v3500_v56  ;;  %v3561_v6 = vadd.f32 %v3560_v51, %v3534_v11  ;;  %v4334_v24 = vadd.f32 %v4306_v20, %v4186_v48  ;;  %v2988_v22 = vpop.f32.mrb[25].mxu0 }
 0x1f5   : > { %v4335_v60 = vadd.f32 %v2988_v22, %v1726_v57  ;;  %v4307_v62 = vpop.f32.mrb[26].mxu0 }
 0x1f6   : > { %v3562_v63 = vadd.f32 %v3561_v6, %v3535_v59  ;;  %3057 = vst [vmem:[%s5486_s4 + $0xd0] sm:$0xff] %v4334_v24  ;;  %v3502_v29 = vadd.f32 %v3501_v5, %v3475_v46  ;;  %v4336_v7 = vadd.f32 %v4307_v62, %v4187_v58  ;;  %v2991_v12 = vpop.f32.mrb[27].mxu0  ;;  %v3539_v61 = vmul.f32 %v4334_v24, %v4334_v24 }
 0x1f7   : > { %3055 = vst [vmem:[%s5486_s4 + $0xc0] sm:$0xff] %v4335_v60  ;;  %v3537_v16 = vmul.f32 %v4335_v60, %v4335_v60  ;;  %v4337_v52 = vadd.f32 %v2991_v12, %v1729_v26 }
 0x1f8   : > { %v3503_v1 = vadd.f32 %v4335_v60, %v3502_v29  ;;  %v3563_v50 = vadd.f32 %v3562_v63, %v3536_v2  ;;  %3058 = vst [vmem:[%s5486_s4 + $0xd8] sm:$0xff] %v4336_v7  ;;  %v3479_v53 = vsel %vm3451_vm1, %v4336_v7, 0.0 }
 0x1f9   : > { %3056 = vst [vmem:[%s5486_s4 + $0xc8] sm:$0xff] %v4337_v52  ;;  %v3477_v4 = vsel %vm3449_vm0, %v4337_v52, 0.0  ;;  %v3540_v3 = vmul.f32 %v3479_v53, %v3479_v53 }
 0x1fa   : > { %v3564_v32 = vadd.f32 %v3563_v50, %v3537_v16  ;;  %v3504_v8 = vadd.f32 %v3503_v1, %v3477_v4  ;;  %v3538_v19 = vmul.f32 %v3477_v4, %v3477_v4 }
 0x1fc   : > { %v3505_v15 = vadd.f32 %v4334_v24, %v3504_v8  ;;  %v3565_v21 = vadd.f32 %v3564_v32, %v3538_v19 }
 0x1fe   : > { %v3506_v48 = vadd.f32 %v3505_v15, %v3479_v53  ;;  %v3566_v35 = vadd.f32 %v3565_v21, %v3539_v61 }
 0x200   : > { %v3507_v57 = vrot.slane %v3506_v48, 4  ;;  %v3567_v0 = vadd.f32 %v3566_v35, %v3540_v3 }
 0x202   : > { %v3508_v18 = vadd.f32 %v3507_v57, %v3506_v48  ;;  %v3568_v42 = vrot.slane %v3567_v0, 4 }
 0x204   : > { %v3509_v40 = vrot.slane %v3508_v18, 2  ;;  %v3569_v58 = vadd.f32 %v3568_v42, %v3567_v0 }
 0x206   : > { %v3510_v38 = vadd.f32 %v3509_v40, %v3508_v18  ;;  %v3570_v13 = vrot.slane %v3569_v58, 2 }
 0x208   : > { %v3511_v30 = vrot.slane %v3510_v38, 1  ;;  %v3571_v26 = vadd.f32 %v3570_v13, %v3569_v58  ;;  %3579 = sbr.rel (%p3897_p11) target bundleno = 527 (0x20f), region = 32 }
 0x20a   : > { %v3572_v27 = vrot.slane %v3571_v26, 1  ;;  %v3512_v31 = vadd.f32 %v3511_v30, %v3510_v38 }
 0x20c   : > { %v3573_v33 = vadd.f32 %v3572_v27, %v3571_v26 }
 0x20e   : > { %v3575_v14 = vsel %vm3574_vm2, %v3512_v31, %v3573_v33 }
 0x20f PF: > { %v3581_v25 = vld [vmem:[#allocation4] sm:$0x3]  ;;  %s4546_s5 = smul.u32 3584, %s4812_s16  ;;  %s3598_s6 = sshll.u32 %s5486_s4, 4  ;;  %s5573_s6 = int_to_ptr.vmem [resolvable:$true] %s3598_s6 }
 0x210   : > { %v3582_v36 = vadd.f32 %v3581_v25, %v3575_v14  ;;  %s5577_s10 = scalar_lea.sflag [#allocation3], %s158_s29  ;;  %s4672_s11 = scalar_lea.vmem %s5573_s6, 3584 }
 0x211   : > { %s5571_s9 = scalar_lea.hbm %s5642_s2, %s4546_s5  ;;  %p4673_p12 = scmp.ne.s32.totalorder %s5573_s6, %s4672_s11 }
 0x212   : > { %3583 = vst [vmem:[#allocation4] sm:$0x3] %v3582_v36  ;;  %s4767_s17 = smov [#allocation2]  }
 0x213   : > { %p4674_p13 = pnand %p4673_p12, %p4831_p5  ;;  %s4676_s19 = sshll.u32 %s4767_s17, 4  ;;  %s4677_s19 = int_to_ptr.vmem [resolvable:$false] %s4676_s19 }
 0x214   : > { %s4678_s20 = scalar_lea.vmem %s4677_s19, 7168  ;;  %p4679_p1 = scmp.lt.s32.totalorder %s5573_s6, %s4677_s19 }
 0x215   : > { %p4675_p0 = pneg %p4674_p13  ;;  %p4680_p3 = scmp.lt.s32.totalorder %s4678_s20, %s4672_s11 }
 0x217   : > { %p4681_p4 = por %p4680_p3, %p4679_p1 }
 0x219   : > { %p4682_p7 = pnand %p4681_p4, %p4675_p0 }
 0x21b   : > { %4685 = shalt.err (!%p4682_p7)
}
 0x21c   : > { %s4686_s24 = scalar_lea.hbm %s5571_s9, 3584  ;;  %s4690_s27 = scalar_lea.hbm %s5642_s2, 7168 }
 0x21d   : > { %p4687_p8 = scmp.ne.s32.totalorder %s5571_s9, %s4686_s24  ;;  %p4691_p11 = scmp.lt.u32.totalorder %s5571_s9, %s5642_s2 }
 0x21e   : > { %p4692_p12 = scmp.lt.u32.totalorder %s4690_s27, %s4686_s24  ;;  %p4694_p0 = scmp.lt.u32.totalorder %s4686_s24, %s5571_s9 }
 0x21f   : > { %p4688_p9 = pnand %p4687_p8, %p4831_p5 }
 0x220   : > { %p4693_p13 = por %p4692_p12, %p4691_p11 }
 0x221   : > { %p4689_p10 = pneg %p4688_p9 }
 0x222   : > { %p4695_p1 = por %p4694_p0, %p4693_p13 }
 0x224   : > { %p4696_p3 = pnand %p4695_p1, %p4689_p10 }
 0x226   : > { %4699 = shalt.err (!%p4696_p3)
}
 0x227   : > { %s4768_s30 = smov 128   ;;  %s4769_s4 = smov 8  }
 0x228   : > { %4547 = dma.vmem_to_hbm [thread:$0]  (%p4831_p5), %s5573_s6, 3584, %s5571_s9, %s5577_s10, %s4768_s30, %s4768_s30, %s4769_s4  }
 0x229   : > { %s4770_s5 = smov [#allocation4]  }
 0x22a   : > { %s3612_s7 = sshll.u32 %s4770_s5, 4  ;;  %s3613_s7 = int_to_ptr.vmem [resolvable:$true] %s3612_s7 }
 0x22b   : > { %s4700_s8 = scalar_lea.vmem %s3613_s7, 32  ;;  %p4707_p9 = scmp.lt.s32.totalorder %s3613_s7, %s3613_s7 }
 0x22c   : > { %p4701_p4 = scmp.ne.s32.totalorder %s3613_s7, %s4700_s8  ;;  %p4708_p10 = scmp.lt.s32.totalorder %s4700_s8, %s4700_s8 }
 0x22e   : > { %p4702_p7 = pnand %p4701_p4, %p83_p2  ;;  %p4709_p11 = por %p4708_p10, %p4707_p9 }
 0x230   : > { %p4703_p8 = pneg %p4702_p7 }
 0x232   : > { %p4710_p12 = pnand %p4709_p11, %p4703_p8 }
 0x234   : > { %4713 = shalt.err (!%p4710_p12)
}
 0x235   : > { %s4714_s19 = scalar_lea.hbm %s5643_s3, 32 }
 0x236   : > { %p4715_p5 = scmp.ne.s32.totalorder %s5643_s3, %s4714_s19  ;;  %p4720_p1 = scmp.lt.u32.totalorder %s4714_s19, %s5643_s3 }
 0x238   : > { %p4716_p13 = pnand %p4715_p5, %p83_p2 }
 0x23a   : > { %p4717_p0 = pneg %p4716_p13 }
 0x23c   : > { %p4722_p3 = pnand %p4720_p1, %p4717_p0 }
 0x23e   : > { %4725 = shalt.err (!%p4722_p3)
}
 0x23f   : > { %4549 = dma.vmem_to_hbm [thread:$0]  (%p83_p2), %s3613_s7, 32, %s5643_s3, [#allocation5]  }
 0x240   : > { %4743 = dma.done.wait (%p83_p2), [#allocation5], 32  }
 0x241   : > { %4745 = vsyncadd (%p83_p2), [#allocation5], 4294967264 }
 0x242 PF: > { %p4559_p4 = scmp.ge.s32.totalorder %s4764_s15, 2  ;;  %s3628_s25 = sand.u32 1, %s4752_s12  }
 0x243   : > { %s3629_s26 = scalar_lea.sflag [#allocation3], %s3628_s25 }
 0x244   : > { %p4554_p7 = pnand %p4559_p4, %p4835_p6 }
 0x246   : > { %4747 = dma.done.wait (!%p4554_p7), %s3629_s26, 3584  }
 0x247   : > { %4749 = vsyncadd (!%p4554_p7), %s3629_s26, 4294963712  ;;  %p15_p8 = scmp.ge.s32.totalorder %s4816_s18, 4   ;;  %s5656_s12 = smov %s4756_s13 }
 0x248   : > { %s5657_s13 = smov %s4760_s14  ;;  %s5658_s14 = smov %s4827_s21 }
 0x249   : > { %s5659_s15 = smov %s4816_s18  ;;  %17 = sbr.rel (!%p15_p8) target bundleno = 4 (0x4), region = 83 }
 0x250   :  { %3634 = vsyncpa [#allocation3], 1 }
 0x251   :  { %3636 = vsyncpa [#allocation3 + $0x1], 1 }
 0x252   :  { %3637 = vsyncpa [#allocation5], 1 }

</bundles_post_ra>
